<compile_context>
chip_gen: v7x
topology: tpu7x:2x2x1
jax: 0.10.0
libtpu: 0.0.40
codegen_flags: <defaults>
</compile_context>

<pallas_src>
import functools
import math

import jax
import jax.numpy as jnp
from jax import lax
from jax.experimental import pallas as pl
from jax.experimental.pallas import tpu as pltpu


# ----------------------------- in-kernel helpers -----------------------------

def _sigmoid(v):
    # tanh-based sigmoid: numerically stable and lowers to the EUP (tanh) slot.
    return 0.5 * (jnp.tanh(0.5 * v) + 1.0)


def _silu(v):
    return v * _sigmoid(v)


def _layernorm(v, g, b, eps=1e-5):
    # v: (N, D); g, b: (1, D); all f32
    mu = jnp.mean(v, axis=-1, keepdims=True)
    c = v - mu
    var = jnp.mean(c * c, axis=-1, keepdims=True)
    return c * lax.rsqrt(var + eps) * g + b


# ------------------------------- kernel part 1 --------------------------------
# FFN1 (half residual) + multi-head self-attention + conv-module front half
# (LayerNorm -> pointwise(2C) -> GLU -> depthwise conv).  Emits the post-attention
# residual and the depthwise-conv output; BatchNorm needs statistics over ALL
# (B, T) rows, so it is applied in part 2 after a cross-tile reduction.

def _conformer_part1_kernel(
        x_ref,
        f1_lng, f1_lnb, f1_w1, f1_b1, f1_w2, f1_b2,
        at_lng, at_lnb, w_qkv, b_qkv, w_out, b_out,
        cv_lng, cv_lnb, pw1_w, pw1_b, dw_w, dw_b,
        cur_ref, dwc_ref,
        *, seq_len, num_heads):
    f32 = jnp.float32
    bf16 = jnp.bfloat16
    BT, D = x_ref.shape            # folded rows (= batch_tile * T), feature dim
    T = seq_len
    bb = BT // T                   # batch elements in this tile
    C = D                          # num_channels == input_dim in this module
    Hh = num_heads
    dh = D // Hh
    K = dw_w.shape[0]
    pad = (K - 1) // 2
    scale = 1.0 / math.sqrt(dh)

    x = x_ref[...]                 # (BT, D) f32

    # ---- FFN1: cur = x + 0.5 * ffn1(x) -- one folded matmul per projection ----
    h = _layernorm(x, f1_lng[...], f1_lnb[...])
    h = _silu(jnp.dot(h.astype(bf16), f1_w1[...], preferred_element_type=f32)
              + f1_b1[...])
    h = jnp.dot(h.astype(bf16), f1_w2[...], preferred_element_type=f32) + f1_b2[...]
    cur = x + 0.5 * h

    # ---- Multi-head self-attention (fused QKV + fused output projection) ----
    xln = _layernorm(cur, at_lng[...], at_lnb[...])
    qkv = jnp.dot(xln.astype(bf16), w_qkv[...], preferred_element_type=f32) + b_qkv[...]
    q_all, k_all, v_all = qkv[:, :D], qkv[:, D:2 * D], qkv[:, 2 * D:]

    # NOTE: loops over batch-elements-in-tile / heads / conv taps are tiny static
    # constants and intentionally stay unrolled (bounded trip count, LLO visibility).
    ctx_rows = []
    for b in range(bb):
        r0, r1 = b * T, (b + 1) * T
        qb, kb, vb = q_all[r0:r1], k_all[r0:r1], v_all[r0:r1]
        heads = []
        for hh in range(Hh):
            lo, hi = hh * dh, (hh + 1) * dh
            qh = qb[:, lo:hi].astype(bf16)
            kh = kb[:, lo:hi].astype(bf16)
            vh = vb[:, lo:hi].astype(bf16)
            s = lax.dot_general(qh, kh, (((1,), (1,)), ((), ())),
                                preferred_element_type=f32) * scale       # (T, T)
            s = s - jnp.max(s, axis=-1, keepdims=True)
            p = jnp.exp(s)
            p = p * pl.reciprocal(jnp.sum(p, axis=-1, keepdims=True), approx=True)
            heads.append(jnp.dot(p.astype(bf16), vh, preferred_element_type=f32))
        ctx_rows.append(jnp.concatenate(heads, axis=-1))                  # (T, D)
    ctx = jnp.concatenate(ctx_rows, axis=0)                               # (BT, D)
    attn = jnp.dot(ctx.astype(bf16), w_out[...], preferred_element_type=f32) + b_out[...]
    cur = cur + attn
    cur_ref[...] = cur

    # ---- Conv module, front half: LN -> pointwise(2C) -> GLU -> depthwise ----
    h = _layernorm(cur, cv_lng[...], cv_lnb[...])
    pw = jnp.dot(h.astype(bf16), pw1_w[...], preferred_element_type=f32) + pw1_b[...]
    h = pw[:, :C] * _sigmoid(pw[:, C:])                                   # GLU(dim=1)

    # Depthwise conv over time (rows) with SAME zero padding, realised as XLU
    # sublane rolls + an iota validity mask (no (T, T) shift-matrix matmuls).
    # pltpu.roll follows np.roll semantics: roll(h, s)[i] = h[(i - s) % BT], so
    # shift = (-d) % BT gives rolled[i] = h[(i + d) % BT]; the mask zeroes rows
    # whose source falls outside the same length-T sequence (incl. wraparound).
    t_idx = lax.broadcasted_iota(jnp.int32, (BT, 1), 0) % T               # hoisted
    acc = h * dw_w[pad]                                                   # center tap
    for kk in range(K):
        d = kk - pad
        if d == 0:
            continue
        rolled = pltpu.roll(h, (-d) % BT, 0)
        valid = jnp.logical_and(t_idx + d >= 0, t_idx + d < T)
        acc = acc + jnp.where(valid, rolled, 0.0) * dw_w[kk]
    dwc_ref[...] = acc + dw_b[...]


# ------------------------------- kernel part 2 --------------------------------
# BatchNorm (pre-folded affine) -> SiLU -> pointwise conv back to D -> residual,
# then FFN2 (half residual) and the final LayerNorm.  Fully folded (rows, D).

def _conformer_part2_kernel(
        cur_ref, dwc_ref, bn_scale, bn_shift, pw2_w, pw2_b,
        f2_lng, f2_lnb, f2_w1, f2_b1, f2_w2, f2_b2,
        fl_lng, fl_lnb, o_ref):
    f32 = jnp.float32
    bf16 = jnp.bfloat16

    cur = cur_ref[...]
    y = dwc_ref[...] * bn_scale[...] + bn_shift[...]      # BatchNorm1d (batch stats)
    y = _silu(y)
    y = jnp.dot(y.astype(bf16), pw2_w[...], preferred_element_type=f32) + pw2_b[...]
    x = cur + y                                           # conv-module residual

    h = _layernorm(x, f2_lng[...], f2_lnb[...])
    h = _silu(jnp.dot(h.astype(bf16), f2_w1[...], preferred_element_type=f32)
              + f2_b1[...])
    h = jnp.dot(h.astype(bf16), f2_w2[...], preferred_element_type=f32) + f2_b2[...]
    x = x + 0.5 * h
    o_ref[...] = _layernorm(x, fl_lng[...], fl_lnb[...]).astype(o_ref.dtype)


# ------------------------------ parameter setup ------------------------------

def init_params(key, D, F, K):
    """Deterministic synthetic params with the same shapes as the torch module."""
    C = D
    keys = jax.random.split(key, 32)
    it = iter(keys)

    def nrm(shape, scale=0.1):
        return (scale * jax.random.normal(next(it), shape)).astype(jnp.float32)

    ones = lambda s: jnp.ones(s, jnp.float32)
    zeros = lambda s: jnp.zeros(s, jnp.float32)

    p = {}
    p["f1_ln_g"], p["f1_ln_b"] = ones((D,)), zeros((D,))
    p["f1_w1"], p["f1_b1"] = nrm((F, D)), nrm((F,))
    p["f1_w2"], p["f1_b2"] = nrm((D, F)), nrm((D,))
    p["at_ln_g"], p["at_ln_b"] = ones((D,)), zeros((D,))
    p["in_proj_w"], p["in_proj_b"] = nrm((3 * D, D)), nrm((3 * D,))
    p["out_proj_w"], p["out_proj_b"] = nrm((D, D)), nrm((D,))
    p["cv_ln_g"], p["cv_ln_b"] = ones((D,)), zeros((D,))
    p["pw1_w"], p["pw1_b"] = nrm((2 * C, D, 1)), nrm((2 * C,))
    p["dw_w"], p["dw_b"] = nrm((C, 1, K)), nrm((C,))
    p["bn_g"], p["bn_b"] = ones((C,)), zeros((C,))
    p["pw2_w"], p["pw2_b"] = nrm((D, C, 1)), nrm((D,))
    p["f2_ln_g"], p["f2_ln_b"] = ones((D,)), zeros((D,))
    p["f2_w1"], p["f2_b1"] = nrm((F, D)), nrm((F,))
    p["f2_w2"], p["f2_b2"] = nrm((D, F)), nrm((D,))
    p["fl_ln_g"], p["fl_ln_b"] = ones((D,)), zeros((D,))
    return p


def kernel_args(p):
    """Reorient torch-shaped params into kernel-friendly right-multiply layouts.

    Matmul operands go to bf16 (MXU-native input); biases / norm params stay f32.
    """
    f32, bf16 = jnp.float32, jnp.bfloat16
    D = p["f1_ln_g"].shape[0]
    C = D
    K = p["dw_w"].shape[-1]

    row = lambda v: v.reshape(1, -1).astype(f32)
    wmat = lambda v: v.astype(bf16)

    w_qkv = wmat(p["in_proj_w"].T)             # (D, 3D): [q | k | v] columns
    b_qkv = row(p["in_proj_b"])
    w_out = wmat(p["out_proj_w"].T)            # (D, D), applied to concatenated heads
    b_out = row(p["out_proj_b"])

    pw1_w = wmat(p["pw1_w"][:, :, 0].T)        # (D, 2C): [:C]=GLU value, [C:]=GLU gate
    pw1_b = row(p["pw1_b"])
    dw_w = p["dw_w"][:, 0, :].T.reshape(K, 1, C).astype(f32)    # (K, 1, C)
    dw_b = row(p["dw_b"])
    pw2_w = wmat(p["pw2_w"][:, :, 0].T)        # (C, D)
    pw2_b = row(p["pw2_b"])

    args_a = [
        row(p["f1_ln_g"]), row(p["f1_ln_b"]),
        wmat(p["f1_w1"].T), row(p["f1_b1"]), wmat(p["f1_w2"].T), row(p["f1_b2"]),
        row(p["at_ln_g"]), row(p["at_ln_b"]),
        w_qkv, b_qkv, w_out, b_out,
        row(p["cv_ln_g"]), row(p["cv_ln_b"]),
        pw1_w, pw1_b, dw_w, dw_b,
    ]
    args_b = [
        pw2_w, pw2_b,
        row(p["f2_ln_g"]), row(p["f2_ln_b"]),
        wmat(p["f2_w1"].T), row(p["f2_b1"]), wmat(p["f2_w2"].T), row(p["f2_b2"]),
        row(p["fl_ln_g"]), row(p["fl_ln_b"]),
    ]
    return args_a, args_b


# --------------------------------- wrapper -----------------------------------

def _const_spec(a):
    nd = a.ndim
    return pl.BlockSpec(a.shape, lambda i, _nd=nd: (0,) * _nd)


def conformer_layer_forward(x_tbd, params, num_heads, *, batch_tile=None):
    """ConformerLayer forward.  x_tbd: (T, B, D) f32 -> (T, B, D) f32."""
    T, B, D = x_tbd.shape
    C = D
    assert D % num_heads == 0

    if batch_tile is None:                      # largest batch tile with <= ~512 rows
        batch_tile = 1
        for cand in range(B, 0, -1):
            if B % cand == 0 and cand * T <= 512:
                batch_tile = cand
                break
    assert B % batch_tile == 0
    ntiles = B // batch_tile
    rows = batch_tile * T                       # folded (batch, time) rows per block

    # Batch-major fold: (T, B, D) -> (B*T, D); time/batch on sublanes, D on lanes.
    x2 = jnp.transpose(x_tbd, (1, 0, 2)).astype(jnp.float32).reshape(B * T, D)
    args_a, args_b = kernel_args(params)

    tiled = lambda ncol: pl.BlockSpec((rows, ncol), lambda i: (i, 0))
    parallel = pltpu.CompilerParams(dimension_semantics=("parallel",))

    part1 = pl.pallas_call(
        functools.partial(_conformer_part1_kernel,
                          seq_len=T, num_heads=num_heads),
        out_shape=(jax.ShapeDtypeStruct((B * T, D), jnp.float32),   # post-attn residual
                   jax.ShapeDtypeStruct((B * T, C), jnp.float32)),  # depthwise-conv out
        grid=(ntiles,),
        in_specs=[tiled(D)] + [_const_spec(a) for a in args_a],
        out_specs=(tiled(D), tiled(C)),
        compiler_params=parallel,
    )
    cur2, dwc2 = part1(x2, *args_a)

    # BatchNorm1d training-mode statistics couple every (b, t) position across the
    # whole batch; the tiny per-channel reduction runs in plain XLA between the two
    # batch-parallel kernels, and the affine is pre-folded into scale/shift.
    mean = jnp.mean(dwc2, axis=0, keepdims=True)
    var = jnp.maximum(jnp.mean(dwc2 * dwc2, axis=0, keepdims=True) - mean * mean, 0.0)
    inv = lax.rsqrt(var + 1e-5)
    bn_scale = params["bn_g"].reshape(1, C).astype(jnp.float32) * inv
    bn_shift = params["bn_b"].reshape(1, C).astype(jnp.float32) - mean * bn_scale

    part2 = pl.pallas_call(
        _conformer_part2_kernel,
        out_shape=jax.ShapeDtypeStruct((B * T, D), jnp.float32),
        grid=(ntiles,),
        in_specs=([tiled(D), tiled(C), _const_spec(bn_scale), _const_spec(bn_shift)]
                  + [_const_spec(a) for a in args_b]),
        out_specs=tiled(D),
        compiler_params=parallel,
    )
    out2 = part2(cur2, dwc2, bn_scale, bn_shift, *args_b)
    return jnp.transpose(out2.reshape(B, T, D), (1, 0, 2))       # back to (T, B, D)


# ----------------------------------- main -------------------------------------

if __name__ == "__main__":
    T, B, D = 8, 4, 32          # (seq, batch, input_dim)
    FFN = 64                    # ffn_dim
    HEADS = 4                   # num_attention_heads
    KSIZE = 7                   # depthwise_conv_kernel_size (odd)

    key = jax.random.PRNGKey(0)
    kx, kp = jax.random.split(key)
    x = jax.random.normal(kx, (T, B, D), jnp.float32)
    params = init_params(kp, D, FFN, KSIZE)

    out = conformer_layer_forward(x, params, HEADS, batch_tile=2)   # grid=(2,)
    out = jax.block_until_ready(out)
    assert out.shape == (T, B, D)
    assert bool(jnp.all(jnp.isfinite(out)))
    print("KERNEL_OK")
</pallas_src>

<mosaic_0001>
module attributes {stable_mosaic.version = 11 : i64} {
  func.func @_conformer_part1_kernel(%arg0: i32, %arg1: memref<16x32xf32, #tpu.memory_space<vmem>>, %arg2: memref<1x32xf32, #tpu.memory_space<vmem>>, %arg3: memref<1x32xf32, #tpu.memory_space<vmem>>, %arg4: memref<32x64xbf16, #tpu.memory_space<vmem>>, %arg5: memref<1x64xf32, #tpu.memory_space<vmem>>, %arg6: memref<64x32xbf16, #tpu.memory_space<vmem>>, %arg7: memref<1x32xf32, #tpu.memory_space<vmem>>, %arg8: memref<1x32xf32, #tpu.memory_space<vmem>>, %arg9: memref<1x32xf32, #tpu.memory_space<vmem>>, %arg10: memref<32x96xbf16, #tpu.memory_space<vmem>>, %arg11: memref<1x96xf32, #tpu.memory_space<vmem>>, %arg12: memref<32x32xbf16, #tpu.memory_space<vmem>>, %arg13: memref<1x32xf32, #tpu.memory_space<vmem>>, %arg14: memref<1x32xf32, #tpu.memory_space<vmem>>, %arg15: memref<1x32xf32, #tpu.memory_space<vmem>>, %arg16: memref<32x64xbf16, #tpu.memory_space<vmem>>, %arg17: memref<1x64xf32, #tpu.memory_space<vmem>>, %arg18: memref<7x1x32xf32, #tpu.memory_space<vmem>>, %arg19: memref<1x32xf32, #tpu.memory_space<vmem>>, %arg20: memref<16x32xf32, #tpu.memory_space<vmem>>, %arg21: memref<16x32xf32, #tpu.memory_space<vmem>>) attributes {dimension_semantics = [#tpu.dimension_semantics<parallel>], iteration_bounds = array<i64: 2>, scalar_prefetch = 0 : i64, scratch_operands = 0 : i64, tpu.core_type = #tpu.core_type<tc>, window_params = [{transform_indices = @transform_0, window_bounds = array<i64: 16, 32>}, {pipeline_mode = #tpu.pipeline_mode<synchronous>, transform_indices = @transform_1, window_bounds = array<i64: 1, 32>}, {pipeline_mode = #tpu.pipeline_mode<synchronous>, transform_indices = @transform_2, window_bounds = array<i64: 1, 32>}, {pipeline_mode = #tpu.pipeline_mode<synchronous>, transform_indices = @transform_3, window_bounds = array<i64: 32, 64>}, {pipeline_mode = #tpu.pipeline_mode<synchronous>, transform_indices = @transform_4, window_bounds = array<i64: 1, 64>}, {pipeline_mode = #tpu.pipeline_mode<synchronous>, transform_indices = @transform_5, window_bounds = array<i64: 64, 32>}, {pipeline_mode = #tpu.pipeline_mode<synchronous>, transform_indices = @transform_6, window_bounds = array<i64: 1, 32>}, {pipeline_mode = #tpu.pipeline_mode<synchronous>, transform_indices = @transform_7, window_bounds = array<i64: 1, 32>}, {pipeline_mode = #tpu.pipeline_mode<synchronous>, transform_indices = @transform_8, window_bounds = array<i64: 1, 32>}, {pipeline_mode = #tpu.pipeline_mode<synchronous>, transform_indices = @transform_9, window_bounds = array<i64: 32, 96>}, {pipeline_mode = #tpu.pipeline_mode<synchronous>, transform_indices = @transform_10, window_bounds = array<i64: 1, 96>}, {pipeline_mode = #tpu.pipeline_mode<synchronous>, transform_indices = @transform_11, window_bounds = array<i64: 32, 32>}, {pipeline_mode = #tpu.pipeline_mode<synchronous>, transform_indices = @transform_12, window_bounds = array<i64: 1, 32>}, {pipeline_mode = #tpu.pipeline_mode<synchronous>, transform_indices = @transform_13, window_bounds = array<i64: 1, 32>}, {pipeline_mode = #tpu.pipeline_mode<synchronous>, transform_indices = @transform_14, window_bounds = array<i64: 1, 32>}, {pipeline_mode = #tpu.pipeline_mode<synchronous>, transform_indices = @transform_15, window_bounds = array<i64: 32, 64>}, {pipeline_mode = #tpu.pipeline_mode<synchronous>, transform_indices = @transform_16, window_bounds = array<i64: 1, 64>}, {pipeline_mode = #tpu.pipeline_mode<synchronous>, transform_indices = @transform_17, window_bounds = array<i64: 7, 1, 32>}, {pipeline_mode = #tpu.pipeline_mode<synchronous>, transform_indices = @transform_18, window_bounds = array<i64: 1, 32>}, {transform_indices = @transform_19, window_bounds = array<i64: 16, 32>}, {transform_indices = @transform_20, window_bounds = array<i64: 16, 32>}]} {
    %c0 = arith.constant 0 : index
    %c0_0 = arith.constant 0 : index
    %0 = vector.load %arg1[%c0, %c0_0] : memref<16x32xf32, #tpu.memory_space<vmem>>, vector<16x32xf32>
    %c0_1 = arith.constant 0 : index
    %c0_2 = arith.constant 0 : index
    %1 = vector.load %arg2[%c0_1, %c0_2] : memref<1x32xf32, #tpu.memory_space<vmem>>, vector<1x32xf32>
    %c0_3 = arith.constant 0 : index
    %c0_4 = arith.constant 0 : index
    %2 = vector.load %arg3[%c0_3, %c0_4] : memref<1x32xf32, #tpu.memory_space<vmem>>, vector<1x32xf32>
    %cst = arith.constant dense<0.000000e+00> : vector<16xf32>
    %3 = vector.multi_reduction <add>, %0, %cst [1] : vector<16x32xf32> to vector<16xf32>
    %4 = vector.shape_cast %3 : vector<16xf32> to vector<16x1xf32>
    %cst_5 = arith.constant 3.200000e+01 : f32
    %5 = vector.broadcast %cst_5 : f32 to vector<16x1xf32>
    %6 = arith.divf %4, %5 : vector<16x1xf32>
    %7 = vector.broadcast %6 : vector<16x1xf32> to vector<16x32xf32>
    %8 = arith.subf %0, %7 : vector<16x32xf32>
    %9 = arith.mulf %8, %8 : vector<16x32xf32>
    %cst_6 = arith.constant dense<0.000000e+00> : vector<16xf32>
    %10 = vector.multi_reduction <add>, %9, %cst_6 [1] : vector<16x32xf32> to vector<16xf32>
    %11 = vector.shape_cast %10 : vector<16xf32> to vector<16x1xf32>
    %cst_7 = arith.constant 3.200000e+01 : f32
    %12 = vector.broadcast %cst_7 : f32 to vector<16x1xf32>
    %13 = arith.divf %11, %12 : vector<16x1xf32>
    %cst_8 = arith.constant 9.99999974E-6 : f32
    %14 = vector.broadcast %cst_8 : f32 to vector<16x1xf32>
    %15 = arith.addf %13, %14 : vector<16x1xf32>
    %16 = math.rsqrt %15 : vector<16x1xf32>
    %17 = vector.broadcast %16 : vector<16x1xf32> to vector<16x32xf32>
    %18 = arith.mulf %8, %17 : vector<16x32xf32>
    %19 = vector.broadcast %1 : vector<1x32xf32> to vector<16x32xf32>
    %20 = arith.mulf %18, %19 : vector<16x32xf32>
    %21 = vector.broadcast %2 : vector<1x32xf32> to vector<16x32xf32>
    %22 = arith.addf %20, %21 : vector<16x32xf32>
    %23 = arith.truncf %22 : vector<16x32xf32> to vector<16x32xbf16>
    %c0_9 = arith.constant 0 : index
    %c0_10 = arith.constant 0 : index
    %24 = vector.load %arg4[%c0_9, %c0_10] : memref<32x64xbf16, #tpu.memory_space<vmem>>, vector<32x64xbf16>
    %cst_11 = arith.constant dense<0.000000e+00> : vector<16x64xf32>
    %25 = tpu.matmul %23, %24, %cst_11 {dimension_numbers = #tpu.dot_dimension_numbers<[1], [0], [0], [1], [0, 0, 1, 1], [], []>} : vector<16x32xbf16>, vector<32x64xbf16>, vector<16x64xf32> -> vector<16x64xf32>
    %c0_12 = arith.constant 0 : index
    %c0_13 = arith.constant 0 : index
    %26 = vector.load %arg5[%c0_12, %c0_13] : memref<1x64xf32, #tpu.memory_space<vmem>>, vector<1x64xf32>
    %27 = vector.broadcast %26 : vector<1x64xf32> to vector<16x64xf32>
    %28 = arith.addf %25, %27 : vector<16x64xf32>
    %cst_14 = arith.constant 5.000000e-01 : f32
    %29 = vector.broadcast %cst_14 : f32 to vector<16x64xf32>
    %30 = arith.mulf %29, %28 : vector<16x64xf32>
    %31 = math.tanh %30 : vector<16x64xf32>
    %cst_15 = arith.constant 1.000000e+00 : f32
    %32 = vector.broadcast %cst_15 : f32 to vector<16x64xf32>
    %33 = arith.addf %31, %32 : vector<16x64xf32>
    %cst_16 = arith.constant 5.000000e-01 : f32
    %34 = vector.broadcast %cst_16 : f32 to vector<16x64xf32>
    %35 = arith.mulf %34, %33 : vector<16x64xf32>
    %36 = arith.mulf %28, %35 : vector<16x64xf32>
    %37 = arith.truncf %36 : vector<16x64xf32> to vector<16x64xbf16>
    %c0_17 = arith.constant 0 : index
    %c0_18 = arith.constant 0 : index
    %38 = vector.load %arg6[%c0_17, %c0_18] : memref<64x32xbf16, #tpu.memory_space<vmem>>, vector<64x32xbf16>
    %cst_19 = arith.constant dense<0.000000e+00> : vector<16x32xf32>
    %39 = tpu.matmul %37, %38, %cst_19 {dimension_numbers = #tpu.dot_dimension_numbers<[1], [0], [0], [1], [0, 0, 1, 1], [], []>} : vector<16x64xbf16>, vector<64x32xbf16>, vector<16x32xf32> -> vector<16x32xf32>
    %c0_20 = arith.constant 0 : index
    %c0_21 = arith.constant 0 : index
    %40 = vector.load %arg7[%c0_20, %c0_21] : memref<1x32xf32, #tpu.memory_space<vmem>>, vector<1x32xf32>
    %41 = vector.broadcast %40 : vector<1x32xf32> to vector<16x32xf32>
    %42 = arith.addf %39, %41 : vector<16x32xf32>
    %cst_22 = arith.constant 5.000000e-01 : f32
    %43 = vector.broadcast %cst_22 : f32 to vector<16x32xf32>
    %44 = arith.mulf %43, %42 : vector<16x32xf32>
    %45 = arith.addf %0, %44 : vector<16x32xf32>
    %c0_23 = arith.constant 0 : index
    %c0_24 = arith.constant 0 : index
    %46 = vector.load %arg8[%c0_23, %c0_24] : memref<1x32xf32, #tpu.memory_space<vmem>>, vector<1x32xf32>
    %c0_25 = arith.constant 0 : index
    %c0_26 = arith.constant 0 : index
    %47 = vector.load %arg9[%c0_25, %c0_26] : memref<1x32xf32, #tpu.memory_space<vmem>>, vector<1x32xf32>
    %cst_27 = arith.constant dense<0.000000e+00> : vector<16xf32>
    %48 = vector.multi_reduction <add>, %45, %cst_27 [1] : vector<16x32xf32> to vector<16xf32>
    %49 = vector.shape_cast %48 : vector<16xf32> to vector<16x1xf32>
    %cst_28 = arith.constant 3.200000e+01 : f32
    %50 = vector.broadcast %cst_28 : f32 to vector<16x1xf32>
    %51 = arith.divf %49, %50 : vector<16x1xf32>
    %52 = vector.broadcast %51 : vector<16x1xf32> to vector<16x32xf32>
    %53 = arith.subf %45, %52 : vector<16x32xf32>
    %54 = arith.mulf %53, %53 : vector<16x32xf32>
    %cst_29 = arith.constant dense<0.000000e+00> : vector<16xf32>
    %55 = vector.multi_reduction <add>, %54, %cst_29 [1] : vector<16x32xf32> to vector<16xf32>
    %56 = vector.shape_cast %55 : vector<16xf32> to vector<16x1xf32>
    %cst_30 = arith.constant 3.200000e+01 : f32
    %57 = vector.broadcast %cst_30 : f32 to vector<16x1xf32>
    %58 = arith.divf %56, %57 : vector<16x1xf32>
    %cst_31 = arith.constant 9.99999974E-6 : f32
    %59 = vector.broadcast %cst_31 : f32 to vector<16x1xf32>
    %60 = arith.addf %58, %59 : vector<16x1xf32>
    %61 = math.rsqrt %60 : vector<16x1xf32>
    %62 = vector.broadcast %61 : vector<16x1xf32> to vector<16x32xf32>
    %63 = arith.mulf %53, %62 : vector<16x32xf32>
    %64 = vector.broadcast %46 : vector<1x32xf32> to vector<16x32xf32>
    %65 = arith.mulf %63, %64 : vector<16x32xf32>
    %66 = vector.broadcast %47 : vector<1x32xf32> to vector<16x32xf32>
    %67 = arith.addf %65, %66 : vector<16x32xf32>
    %68 = arith.truncf %67 : vector<16x32xf32> to vector<16x32xbf16>
    %c0_32 = arith.constant 0 : index
    %c0_33 = arith.constant 0 : index
    %69 = vector.load %arg10[%c0_32, %c0_33] : memref<32x96xbf16, #tpu.memory_space<vmem>>, vector<32x96xbf16>
    %cst_34 = arith.constant dense<0.000000e+00> : vector<16x96xf32>
    %70 = tpu.matmul %68, %69, %cst_34 {dimension_numbers = #tpu.dot_dimension_numbers<[1], [0], [0], [1], [0, 0, 1, 1], [], []>} : vector<16x32xbf16>, vector<32x96xbf16>, vector<16x96xf32> -> vector<16x96xf32>
    %c0_35 = arith.constant 0 : index
    %c0_36 = arith.constant 0 : index
    %71 = vector.load %arg11[%c0_35, %c0_36] : memref<1x96xf32, #tpu.memory_space<vmem>>, vector<1x96xf32>
    %72 = vector.broadcast %71 : vector<1x96xf32> to vector<16x96xf32>
    %73 = arith.addf %70, %72 : vector<16x96xf32>
    %74 = vector.extract_strided_slice %73 {offsets = [0, 0], sizes = [16, 32], strides = [1, 1]} : vector<16x96xf32> to vector<16x32xf32>
    %75 = vector.extract_strided_slice %73 {offsets = [0, 32], sizes = [16, 32], strides = [1, 1]} : vector<16x96xf32> to vector<16x32xf32>
    %76 = vector.extract_strided_slice %73 {offsets = [0, 64], sizes = [16, 32], strides = [1, 1]} : vector<16x96xf32> to vector<16x32xf32>
    %77 = vector.extract_strided_slice %74 {offsets = [0, 0], sizes = [8, 32], strides = [1, 1]} : vector<16x32xf32> to vector<8x32xf32>
    %78 = vector.extract_strided_slice %75 {offsets = [0, 0], sizes = [8, 32], strides = [1, 1]} : vector<16x32xf32> to vector<8x32xf32>
    %79 = vector.extract_strided_slice %76 {offsets = [0, 0], sizes = [8, 32], strides = [1, 1]} : vector<16x32xf32> to vector<8x32xf32>
    %80 = vector.extract_strided_slice %77 {offsets = [0, 0], sizes = [8, 8], strides = [1, 1]} : vector<8x32xf32> to vector<8x8xf32>
    %81 = arith.truncf %80 : vector<8x8xf32> to vector<8x8xbf16>
    %82 = vector.extract_strided_slice %78 {offsets = [0, 0], sizes = [8, 8], strides = [1, 1]} : vector<8x32xf32> to vector<8x8xf32>
    %83 = arith.truncf %82 : vector<8x8xf32> to vector<8x8xbf16>
    %84 = vector.extract_strided_slice %79 {offsets = [0, 0], sizes = [8, 8], strides = [1, 1]} : vector<8x32xf32> to vector<8x8xf32>
    %85 = arith.truncf %84 : vector<8x8xf32> to vector<8x8xbf16>
    %cst_37 = arith.constant dense<0.000000e+00> : vector<8x8xf32>
    %86 = tpu.matmul %81, %83, %cst_37 {dimension_numbers = #tpu.dot_dimension_numbers<[1], [1], [0], [0], [0, 0, 1, 0], [], []>} : vector<8x8xbf16>, vector<8x8xbf16>, vector<8x8xf32> -> vector<8x8xf32>
    %cst_38 = arith.constant 0.353553385 : f32
    %87 = vector.broadcast %cst_38 : f32 to vector<8x8xf32>
    %88 = arith.mulf %86, %87 : vector<8x8xf32>
    %cst_39 = arith.constant dense<0xFF800000> : vector<8xf32>
    %89 = vector.multi_reduction <maximumf>, %88, %cst_39 [1] : vector<8x8xf32> to vector<8xf32>
    %90 = vector.shape_cast %89 : vector<8xf32> to vector<8x1xf32>
    %91 = vector.broadcast %90 : vector<8x1xf32> to vector<8x8xf32>
    %92 = arith.subf %88, %91 : vector<8x8xf32>
    %93 = math.exp %92 : vector<8x8xf32>
    %cst_40 = arith.constant dense<0.000000e+00> : vector<8xf32>
    %94 = vector.multi_reduction <add>, %93, %cst_40 [1] : vector<8x8xf32> to vector<8xf32>
    %95 = vector.shape_cast %94 : vector<8xf32> to vector<8x1xf32>
    %96 = tpu.reciprocal %95 {approx = true} : vector<8x1xf32> -> vector<8x1xf32>
    %97 = vector.broadcast %96 : vector<8x1xf32> to vector<8x8xf32>
    %98 = arith.mulf %93, %97 : vector<8x8xf32>
    %99 = arith.truncf %98 : vector<8x8xf32> to vector<8x8xbf16>
    %cst_41 = arith.constant dense<0.000000e+00> : vector<8x8xf32>
    %100 = tpu.matmul %99, %85, %cst_41 {dimension_numbers = #tpu.dot_dimension_numbers<[1], [0], [0], [1], [0, 0, 1, 1], [], []>} : vector<8x8xbf16>, vector<8x8xbf16>, vector<8x8xf32> -> vector<8x8xf32>
    %101 = vector.extract_strided_slice %77 {offsets = [0, 8], sizes = [8, 8], strides = [1, 1]} : vector<8x32xf32> to vector<8x8xf32>
    %102 = arith.truncf %101 : vector<8x8xf32> to vector<8x8xbf16>
    %103 = vector.extract_strided_slice %78 {offsets = [0, 8], sizes = [8, 8], strides = [1, 1]} : vector<8x32xf32> to vector<8x8xf32>
    %104 = arith.truncf %103 : vector<8x8xf32> to vector<8x8xbf16>
    %105 = vector.extract_strided_slice %79 {offsets = [0, 8], sizes = [8, 8], strides = [1, 1]} : vector<8x32xf32> to vector<8x8xf32>
    %106 = arith.truncf %105 : vector<8x8xf32> to vector<8x8xbf16>
    %cst_42 = arith.constant dense<0.000000e+00> : vector<8x8xf32>
    %107 = tpu.matmul %102, %104, %cst_42 {dimension_numbers = #tpu.dot_dimension_numbers<[1], [1], [0], [0], [0, 0, 1, 0], [], []>} : vector<8x8xbf16>, vector<8x8xbf16>, vector<8x8xf32> -> vector<8x8xf32>
    %cst_43 = arith.constant 0.353553385 : f32
    %108 = vector.broadcast %cst_43 : f32 to vector<8x8xf32>
    %109 = arith.mulf %107, %108 : vector<8x8xf32>
    %cst_44 = arith.constant dense<0xFF800000> : vector<8xf32>
    %110 = vector.multi_reduction <maximumf>, %109, %cst_44 [1] : vector<8x8xf32> to vector<8xf32>
    %111 = vector.shape_cast %110 : vector<8xf32> to vector<8x1xf32>
    %112 = vector.broadcast %111 : vector<8x1xf32> to vector<8x8xf32>
    %113 = arith.subf %109, %112 : vector<8x8xf32>
    %114 = math.exp %113 : vector<8x8xf32>
    %cst_45 = arith.constant dense<0.000000e+00> : vector<8xf32>
    %115 = vector.multi_reduction <add>, %114, %cst_45 [1] : vector<8x8xf32> to vector<8xf32>
    %116 = vector.shape_cast %115 : vector<8xf32> to vector<8x1xf32>
    %117 = tpu.reciprocal %116 {approx = true} : vector<8x1xf32> -> vector<8x1xf32>
    %118 = vector.broadcast %117 : vector<8x1xf32> to vector<8x8xf32>
    %119 = arith.mulf %114, %118 : vector<8x8xf32>
    %120 = arith.truncf %119 : vector<8x8xf32> to vector<8x8xbf16>
    %cst_46 = arith.constant dense<0.000000e+00> : vector<8x8xf32>
    %121 = tpu.matmul %120, %106, %cst_46 {dimension_numbers = #tpu.dot_dimension_numbers<[1], [0], [0], [1], [0, 0, 1, 1], [], []>} : vector<8x8xbf16>, vector<8x8xbf16>, vector<8x8xf32> -> vector<8x8xf32>
    %122 = vector.extract_strided_slice %77 {offsets = [0, 16], sizes = [8, 8], strides = [1, 1]} : vector<8x32xf32> to vector<8x8xf32>
    %123 = arith.truncf %122 : vector<8x8xf32> to vector<8x8xbf16>
    %124 = vector.extract_strided_slice %78 {offsets = [0, 16], sizes = [8, 8], strides = [1, 1]} : vector<8x32xf32> to vector<8x8xf32>
    %125 = arith.truncf %124 : vector<8x8xf32> to vector<8x8xbf16>
    %126 = vector.extract_strided_slice %79 {offsets = [0, 16], sizes = [8, 8], strides = [1, 1]} : vector<8x32xf32> to vector<8x8xf32>
    %127 = arith.truncf %126 : vector<8x8xf32> to vector<8x8xbf16>
    %cst_47 = arith.constant dense<0.000000e+00> : vector<8x8xf32>
    %128 = tpu.matmul %123, %125, %cst_47 {dimension_numbers = #tpu.dot_dimension_numbers<[1], [1], [0], [0], [0, 0, 1, 0], [], []>} : vector<8x8xbf16>, vector<8x8xbf16>, vector<8x8xf32> -> vector<8x8xf32>
    %cst_48 = arith.constant 0.353553385 : f32
    %129 = vector.broadcast %cst_48 : f32 to vector<8x8xf32>
    %130 = arith.mulf %128, %129 : vector<8x8xf32>
    %cst_49 = arith.constant dense<0xFF800000> : vector<8xf32>
    %131 = vector.multi_reduction <maximumf>, %130, %cst_49 [1] : vector<8x8xf32> to vector<8xf32>
    %132 = vector.shape_cast %131 : vector<8xf32> to vector<8x1xf32>
    %133 = vector.broadcast %132 : vector<8x1xf32> to vector<8x8xf32>
    %134 = arith.subf %130, %133 : vector<8x8xf32>
    %135 = math.exp %134 : vector<8x8xf32>
    %cst_50 = arith.constant dense<0.000000e+00> : vector<8xf32>
    %136 = vector.multi_reduction <add>, %135, %cst_50 [1] : vector<8x8xf32> to vector<8xf32>
    %137 = vector.shape_cast %136 : vector<8xf32> to vector<8x1xf32>
    %138 = tpu.reciprocal %137 {approx = true} : vector<8x1xf32> -> vector<8x1xf32>
    %139 = vector.broadcast %138 : vector<8x1xf32> to vector<8x8xf32>
    %140 = arith.mulf %135, %139 : vector<8x8xf32>
    %141 = arith.truncf %140 : vector<8x8xf32> to vector<8x8xbf16>
    %cst_51 = arith.constant dense<0.000000e+00> : vector<8x8xf32>
    %142 = tpu.matmul %141, %127, %cst_51 {dimension_numbers = #tpu.dot_dimension_numbers<[1], [0], [0], [1], [0, 0, 1, 1], [], []>} : vector<8x8xbf16>, vector<8x8xbf16>, vector<8x8xf32> -> vector<8x8xf32>
    %143 = vector.extract_strided_slice %77 {offsets = [0, 24], sizes = [8, 8], strides = [1, 1]} : vector<8x32xf32> to vector<8x8xf32>
    %144 = arith.truncf %143 : vector<8x8xf32> to vector<8x8xbf16>
    %145 = vector.extract_strided_slice %78 {offsets = [0, 24], sizes = [8, 8], strides = [1, 1]} : vector<8x32xf32> to vector<8x8xf32>
    %146 = arith.truncf %145 : vector<8x8xf32> to vector<8x8xbf16>
    %147 = vector.extract_strided_slice %79 {offsets = [0, 24], sizes = [8, 8], strides = [1, 1]} : vector<8x32xf32> to vector<8x8xf32>
    %148 = arith.truncf %147 : vector<8x8xf32> to vector<8x8xbf16>
    %cst_52 = arith.constant dense<0.000000e+00> : vector<8x8xf32>
    %149 = tpu.matmul %144, %146, %cst_52 {dimension_numbers = #tpu.dot_dimension_numbers<[1], [1], [0], [0], [0, 0, 1, 0], [], []>} : vector<8x8xbf16>, vector<8x8xbf16>, vector<8x8xf32> -> vector<8x8xf32>
    %cst_53 = arith.constant 0.353553385 : f32
    %150 = vector.broadcast %cst_53 : f32 to vector<8x8xf32>
    %151 = arith.mulf %149, %150 : vector<8x8xf32>
    %cst_54 = arith.constant dense<0xFF800000> : vector<8xf32>
    %152 = vector.multi_reduction <maximumf>, %151, %cst_54 [1] : vector<8x8xf32> to vector<8xf32>
    %153 = vector.shape_cast %152 : vector<8xf32> to vector<8x1xf32>
    %154 = vector.broadcast %153 : vector<8x1xf32> to vector<8x8xf32>
    %155 = arith.subf %151, %154 : vector<8x8xf32>
    %156 = math.exp %155 : vector<8x8xf32>
    %cst_55 = arith.constant dense<0.000000e+00> : vector<8xf32>
    %157 = vector.multi_reduction <add>, %156, %cst_55 [1] : vector<8x8xf32> to vector<8xf32>
    %158 = vector.shape_cast %157 : vector<8xf32> to vector<8x1xf32>
    %159 = tpu.reciprocal %158 {approx = true} : vector<8x1xf32> -> vector<8x1xf32>
    %160 = vector.broadcast %159 : vector<8x1xf32> to vector<8x8xf32>
    %161 = arith.mulf %156, %160 : vector<8x8xf32>
    %162 = arith.truncf %161 : vector<8x8xf32> to vector<8x8xbf16>
    %cst_56 = arith.constant dense<0.000000e+00> : vector<8x8xf32>
    %163 = tpu.matmul %162, %148, %cst_56 {dimension_numbers = #tpu.dot_dimension_numbers<[1], [0], [0], [1], [0, 0, 1, 1], [], []>} : vector<8x8xbf16>, vector<8x8xbf16>, vector<8x8xf32> -> vector<8x8xf32>
    %164 = tpu.concatenate %100, %121, %142, %163 in 1 : vector<8x8xf32>, vector<8x8xf32>, vector<8x8xf32>, vector<8x8xf32> -> vector<8x32xf32>
    %165 = vector.extract_strided_slice %74 {offsets = [8, 0], sizes = [8, 32], strides = [1, 1]} : vector<16x32xf32> to vector<8x32xf32>
    %166 = vector.extract_strided_slice %75 {offsets = [8, 0], sizes = [8, 32], strides = [1, 1]} : vector<16x32xf32> to vector<8x32xf32>
    %167 = vector.extract_strided_slice %76 {offsets = [8, 0], sizes = [8, 32], strides = [1, 1]} : vector<16x32xf32> to vector<8x32xf32>
    %168 = vector.extract_strided_slice %165 {offsets = [0, 0], sizes = [8, 8], strides = [1, 1]} : vector<8x32xf32> to vector<8x8xf32>
    %169 = arith.truncf %168 : vector<8x8xf32> to vector<8x8xbf16>
    %170 = vector.extract_strided_slice %166 {offsets = [0, 0], sizes = [8, 8], strides = [1, 1]} : vector<8x32xf32> to vector<8x8xf32>
    %171 = arith.truncf %170 : vector<8x8xf32> to vector<8x8xbf16>
    %172 = vector.extract_strided_slice %167 {offsets = [0, 0], sizes = [8, 8], strides = [1, 1]} : vector<8x32xf32> to vector<8x8xf32>
    %173 = arith.truncf %172 : vector<8x8xf32> to vector<8x8xbf16>
    %cst_57 = arith.constant dense<0.000000e+00> : vector<8x8xf32>
    %174 = tpu.matmul %169, %171, %cst_57 {dimension_numbers = #tpu.dot_dimension_numbers<[1], [1], [0], [0], [0, 0, 1, 0], [], []>} : vector<8x8xbf16>, vector<8x8xbf16>, vector<8x8xf32> -> vector<8x8xf32>
    %cst_58 = arith.constant 0.353553385 : f32
    %175 = vector.broadcast %cst_58 : f32 to vector<8x8xf32>
    %176 = arith.mulf %174, %175 : vector<8x8xf32>
    %cst_59 = arith.constant dense<0xFF800000> : vector<8xf32>
    %177 = vector.multi_reduction <maximumf>, %176, %cst_59 [1] : vector<8x8xf32> to vector<8xf32>
    %178 = vector.shape_cast %177 : vector<8xf32> to vector<8x1xf32>
    %179 = vector.broadcast %178 : vector<8x1xf32> to vector<8x8xf32>
    %180 = arith.subf %176, %179 : vector<8x8xf32>
    %181 = math.exp %180 : vector<8x8xf32>
    %cst_60 = arith.constant dense<0.000000e+00> : vector<8xf32>
    %182 = vector.multi_reduction <add>, %181, %cst_60 [1] : vector<8x8xf32> to vector<8xf32>
    %183 = vector.shape_cast %182 : vector<8xf32> to vector<8x1xf32>
    %184 = tpu.reciprocal %183 {approx = true} : vector<8x1xf32> -> vector<8x1xf32>
    %185 = vector.broadcast %184 : vector<8x1xf32> to vector<8x8xf32>
    %186 = arith.mulf %181, %185 : vector<8x8xf32>
    %187 = arith.truncf %186 : vector<8x8xf32> to vector<8x8xbf16>
    %cst_61 = arith.constant dense<0.000000e+00> : vector<8x8xf32>
    %188 = tpu.matmul %187, %173, %cst_61 {dimension_numbers = #tpu.dot_dimension_numbers<[1], [0], [0], [1], [0, 0, 1, 1], [], []>} : vector<8x8xbf16>, vector<8x8xbf16>, vector<8x8xf32> -> vector<8x8xf32>
    %189 = vector.extract_strided_slice %165 {offsets = [0, 8], sizes = [8, 8], strides = [1, 1]} : vector<8x32xf32> to vector<8x8xf32>
    %190 = arith.truncf %189 : vector<8x8xf32> to vector<8x8xbf16>
    %191 = vector.extract_strided_slice %166 {offsets = [0, 8], sizes = [8, 8], strides = [1, 1]} : vector<8x32xf32> to vector<8x8xf32>
    %192 = arith.truncf %191 : vector<8x8xf32> to vector<8x8xbf16>
    %193 = vector.extract_strided_slice %167 {offsets = [0, 8], sizes = [8, 8], strides = [1, 1]} : vector<8x32xf32> to vector<8x8xf32>
    %194 = arith.truncf %193 : vector<8x8xf32> to vector<8x8xbf16>
    %cst_62 = arith.constant dense<0.000000e+00> : vector<8x8xf32>
    %195 = tpu.matmul %190, %192, %cst_62 {dimension_numbers = #tpu.dot_dimension_numbers<[1], [1], [0], [0], [0, 0, 1, 0], [], []>} : vector<8x8xbf16>, vector<8x8xbf16>, vector<8x8xf32> -> vector<8x8xf32>
    %cst_63 = arith.constant 0.353553385 : f32
    %196 = vector.broadcast %cst_63 : f32 to vector<8x8xf32>
    %197 = arith.mulf %195, %196 : vector<8x8xf32>
    %cst_64 = arith.constant dense<0xFF800000> : vector<8xf32>
    %198 = vector.multi_reduction <maximumf>, %197, %cst_64 [1] : vector<8x8xf32> to vector<8xf32>
    %199 = vector.shape_cast %198 : vector<8xf32> to vector<8x1xf32>
    %200 = vector.broadcast %199 : vector<8x1xf32> to vector<8x8xf32>
    %201 = arith.subf %197, %200 : vector<8x8xf32>
    %202 = math.exp %201 : vector<8x8xf32>
    %cst_65 = arith.constant dense<0.000000e+00> : vector<8xf32>
    %203 = vector.multi_reduction <add>, %202, %cst_65 [1] : vector<8x8xf32> to vector<8xf32>
    %204 = vector.shape_cast %203 : vector<8xf32> to vector<8x1xf32>
    %205 = tpu.reciprocal %204 {approx = true} : vector<8x1xf32> -> vector<8x1xf32>
    %206 = vector.broadcast %205 : vector<8x1xf32> to vector<8x8xf32>
    %207 = arith.mulf %202, %206 : vector<8x8xf32>
    %208 = arith.truncf %207 : vector<8x8xf32> to vector<8x8xbf16>
    %cst_66 = arith.constant dense<0.000000e+00> : vector<8x8xf32>
    %209 = tpu.matmul %208, %194, %cst_66 {dimension_numbers = #tpu.dot_dimension_numbers<[1], [0], [0], [1], [0, 0, 1, 1], [], []>} : vector<8x8xbf16>, vector<8x8xbf16>, vector<8x8xf32> -> vector<8x8xf32>
    %210 = vector.extract_strided_slice %165 {offsets = [0, 16], sizes = [8, 8], strides = [1, 1]} : vector<8x32xf32> to vector<8x8xf32>
    %211 = arith.truncf %210 : vector<8x8xf32> to vector<8x8xbf16>
    %212 = vector.extract_strided_slice %166 {offsets = [0, 16], sizes = [8, 8], strides = [1, 1]} : vector<8x32xf32> to vector<8x8xf32>
    %213 = arith.truncf %212 : vector<8x8xf32> to vector<8x8xbf16>
    %214 = vector.extract_strided_slice %167 {offsets = [0, 16], sizes = [8, 8], strides = [1, 1]} : vector<8x32xf32> to vector<8x8xf32>
    %215 = arith.truncf %214 : vector<8x8xf32> to vector<8x8xbf16>
    %cst_67 = arith.constant dense<0.000000e+00> : vector<8x8xf32>
    %216 = tpu.matmul %211, %213, %cst_67 {dimension_numbers = #tpu.dot_dimension_numbers<[1], [1], [0], [0], [0, 0, 1, 0], [], []>} : vector<8x8xbf16>, vector<8x8xbf16>, vector<8x8xf32> -> vector<8x8xf32>
    %cst_68 = arith.constant 0.353553385 : f32
    %217 = vector.broadcast %cst_68 : f32 to vector<8x8xf32>
    %218 = arith.mulf %216, %217 : vector<8x8xf32>
    %cst_69 = arith.constant dense<0xFF800000> : vector<8xf32>
    %219 = vector.multi_reduction <maximumf>, %218, %cst_69 [1] : vector<8x8xf32> to vector<8xf32>
    %220 = vector.shape_cast %219 : vector<8xf32> to vector<8x1xf32>
    %221 = vector.broadcast %220 : vector<8x1xf32> to vector<8x8xf32>
    %222 = arith.subf %218, %221 : vector<8x8xf32>
    %223 = math.exp %222 : vector<8x8xf32>
    %cst_70 = arith.constant dense<0.000000e+00> : vector<8xf32>
    %224 = vector.multi_reduction <add>, %223, %cst_70 [1] : vector<8x8xf32> to vector<8xf32>
    %225 = vector.shape_cast %224 : vector<8xf32> to vector<8x1xf32>
    %226 = tpu.reciprocal %225 {approx = true} : vector<8x1xf32> -> vector<8x1xf32>
    %227 = vector.broadcast %226 : vector<8x1xf32> to vector<8x8xf32>
    %228 = arith.mulf %223, %227 : vector<8x8xf32>
    %229 = arith.truncf %228 : vector<8x8xf32> to vector<8x8xbf16>
    %cst_71 = arith.constant dense<0.000000e+00> : vector<8x8xf32>
    %230 = tpu.matmul %229, %215, %cst_71 {dimension_numbers = #tpu.dot_dimension_numbers<[1], [0], [0], [1], [0, 0, 1, 1], [], []>} : vector<8x8xbf16>, vector<8x8xbf16>, vector<8x8xf32> -> vector<8x8xf32>
    %231 = vector.extract_strided_slice %165 {offsets = [0, 24], sizes = [8, 8], strides = [1, 1]} : vector<8x32xf32> to vector<8x8xf32>
    %232 = arith.truncf %231 : vector<8x8xf32> to vector<8x8xbf16>
    %233 = vector.extract_strided_slice %166 {offsets = [0, 24], sizes = [8, 8], strides = [1, 1]} : vector<8x32xf32> to vector<8x8xf32>
    %234 = arith.truncf %233 : vector<8x8xf32> to vector<8x8xbf16>
    %235 = vector.extract_strided_slice %167 {offsets = [0, 24], sizes = [8, 8], strides = [1, 1]} : vector<8x32xf32> to vector<8x8xf32>
    %236 = arith.truncf %235 : vector<8x8xf32> to vector<8x8xbf16>
    %cst_72 = arith.constant dense<0.000000e+00> : vector<8x8xf32>
    %237 = tpu.matmul %232, %234, %cst_72 {dimension_numbers = #tpu.dot_dimension_numbers<[1], [1], [0], [0], [0, 0, 1, 0], [], []>} : vector<8x8xbf16>, vector<8x8xbf16>, vector<8x8xf32> -> vector<8x8xf32>
    %cst_73 = arith.constant 0.353553385 : f32
    %238 = vector.broadcast %cst_73 : f32 to vector<8x8xf32>
    %239 = arith.mulf %237, %238 : vector<8x8xf32>
    %cst_74 = arith.constant dense<0xFF800000> : vector<8xf32>
    %240 = vector.multi_reduction <maximumf>, %239, %cst_74 [1] : vector<8x8xf32> to vector<8xf32>
    %241 = vector.shape_cast %240 : vector<8xf32> to vector<8x1xf32>
    %242 = vector.broadcast %241 : vector<8x1xf32> to vector<8x8xf32>
    %243 = arith.subf %239, %242 : vector<8x8xf32>
    %244 = math.exp %243 : vector<8x8xf32>
    %cst_75 = arith.constant dense<0.000000e+00> : vector<8xf32>
    %245 = vector.multi_reduction <add>, %244, %cst_75 [1] : vector<8x8xf32> to vector<8xf32>
    %246 = vector.shape_cast %245 : vector<8xf32> to vector<8x1xf32>
    %247 = tpu.reciprocal %246 {approx = true} : vector<8x1xf32> -> vector<8x1xf32>
    %248 = vector.broadcast %247 : vector<8x1xf32> to vector<8x8xf32>
    %249 = arith.mulf %244, %248 : vector<8x8xf32>
    %250 = arith.truncf %249 : vector<8x8xf32> to vector<8x8xbf16>
    %cst_76 = arith.constant dense<0.000000e+00> : vector<8x8xf32>
    %251 = tpu.matmul %250, %236, %cst_76 {dimension_numbers = #tpu.dot_dimension_numbers<[1], [0], [0], [1], [0, 0, 1, 1], [], []>} : vector<8x8xbf16>, vector<8x8xbf16>, vector<8x8xf32> -> vector<8x8xf32>
    %252 = tpu.concatenate %188, %209, %230, %251 in 1 : vector<8x8xf32>, vector<8x8xf32>, vector<8x8xf32>, vector<8x8xf32> -> vector<8x32xf32>
    %253 = tpu.concatenate %164, %252 in 0 : vector<8x32xf32>, vector<8x32xf32> -> vector<16x32xf32>
    %254 = arith.truncf %253 : vector<16x32xf32> to vector<16x32xbf16>
    %c0_77 = arith.constant 0 : index
    %c0_78 = arith.constant 0 : index
    %255 = vector.load %arg12[%c0_77, %c0_78] : memref<32x32xbf16, #tpu.memory_space<vmem>>, vector<32x32xbf16>
    %cst_79 = arith.constant dense<0.000000e+00> : vector<16x32xf32>
    %256 = tpu.matmul %254, %255, %cst_79 {dimension_numbers = #tpu.dot_dimension_numbers<[1], [0], [0], [1], [0, 0, 1, 1], [], []>} : vector<16x32xbf16>, vector<32x32xbf16>, vector<16x32xf32> -> vector<16x32xf32>
    %c0_80 = arith.constant 0 : index
    %c0_81 = arith.constant 0 : index
    %257 = vector.load %arg13[%c0_80, %c0_81] : memref<1x32xf32, #tpu.memory_space<vmem>>, vector<1x32xf32>
    %258 = vector.broadcast %257 : vector<1x32xf32> to vector<16x32xf32>
    %259 = arith.addf %256, %258 : vector<16x32xf32>
    %260 = arith.addf %45, %259 : vector<16x32xf32>
    %c0_82 = arith.constant 0 : index
    %c0_83 = arith.constant 0 : index
    %261 = vector.load %arg20[%c0_82, %c0_83] : memref<16x32xf32, #tpu.memory_space<vmem>>, vector<16x32xf32>
    tpu.vector_store %arg20[%c0_82, %c0_83], %260 {strides = array<i32>} : memref<16x32xf32, #tpu.memory_space<vmem>>, vector<16x32xf32>,
    %c0_84 = arith.constant 0 : index
    %c0_85 = arith.constant 0 : index
    %262 = vector.load %arg14[%c0_84, %c0_85] : memref<1x32xf32, #tpu.memory_space<vmem>>, vector<1x32xf32>
    %c0_86 = arith.constant 0 : index
    %c0_87 = arith.constant 0 : index
    %263 = vector.load %arg15[%c0_86, %c0_87] : memref<1x32xf32, #tpu.memory_space<vmem>>, vector<1x32xf32>
    %cst_88 = arith.constant dense<0.000000e+00> : vector<16xf32>
    %264 = vector.multi_reduction <add>, %260, %cst_88 [1] : vector<16x32xf32> to vector<16xf32>
    %265 = vector.shape_cast %264 : vector<16xf32> to vector<16x1xf32>
    %cst_89 = arith.constant 3.200000e+01 : f32
    %266 = vector.broadcast %cst_89 : f32 to vector<16x1xf32>
    %267 = arith.divf %265, %266 : vector<16x1xf32>
    %268 = vector.broadcast %267 : vector<16x1xf32> to vector<16x32xf32>
    %269 = arith.subf %260, %268 : vector<16x32xf32>
    %270 = arith.mulf %269, %269 : vector<16x32xf32>
    %cst_90 = arith.constant dense<0.000000e+00> : vector<16xf32>
    %271 = vector.multi_reduction <add>, %270, %cst_90 [1] : vector<16x32xf32> to vector<16xf32>
    %272 = vector.shape_cast %271 : vector<16xf32> to vector<16x1xf32>
    %cst_91 = arith.constant 3.200000e+01 : f32
    %273 = vector.broadcast %cst_91 : f32 to vector<16x1xf32>
    %274 = arith.divf %272, %273 : vector<16x1xf32>
    %cst_92 = arith.constant 9.99999974E-6 : f32
    %275 = vector.broadcast %cst_92 : f32 to vector<16x1xf32>
    %276 = arith.addf %274, %275 : vector<16x1xf32>
    %277 = math.rsqrt %276 : vector<16x1xf32>
    %278 = vector.broadcast %277 : vector<16x1xf32> to vector<16x32xf32>
    %279 = arith.mulf %269, %278 : vector<16x32xf32>
    %280 = vector.broadcast %262 : vector<1x32xf32> to vector<16x32xf32>
    %281 = arith.mulf %279, %280 : vector<16x32xf32>
    %282 = vector.broadcast %263 : vector<1x32xf32> to vector<16x32xf32>
    %283 = arith.addf %281, %282 : vector<16x32xf32>
    %284 = arith.truncf %283 : vector<16x32xf32> to vector<16x32xbf16>
    %c0_93 = arith.constant 0 : index
    %c0_94 = arith.constant 0 : index
    %285 = vector.load %arg16[%c0_93, %c0_94] : memref<32x64xbf16, #tpu.memory_space<vmem>>, vector<32x64xbf16>
    %cst_95 = arith.constant dense<0.000000e+00> : vector<16x64xf32>
    %286 = tpu.matmul %284, %285, %cst_95 {dimension_numbers = #tpu.dot_dimension_numbers<[1], [0], [0], [1], [0, 0, 1, 1], [], []>} : vector<16x32xbf16>, vector<32x64xbf16>, vector<16x64xf32> -> vector<16x64xf32>
    %c0_96 = arith.constant 0 : index
    %c0_97 = arith.constant 0 : index
    %287 = vector.load %arg17[%c0_96, %c0_97] : memref<1x64xf32, #tpu.memory_space<vmem>>, vector<1x64xf32>
    %288 = vector.broadcast %287 : vector<1x64xf32> to vector<16x64xf32>
    %289 = arith.addf %286, %288 : vector<16x64xf32>
    %290 = vector.extract_strided_slice %289 {offsets = [0, 0], sizes = [16, 32], strides = [1, 1]} : vector<16x64xf32> to vector<16x32xf32>
    %291 = vector.extract_strided_slice %289 {offsets = [0, 32], sizes = [16, 32], strides = [1, 1]} : vector<16x64xf32> to vector<16x32xf32>
    %cst_98 = arith.constant 5.000000e-01 : f32
    %292 = vector.broadcast %cst_98 : f32 to vector<16x32xf32>
    %293 = arith.mulf %292, %291 : vector<16x32xf32>
    %294 = math.tanh %293 : vector<16x32xf32>
    %cst_99 = arith.constant 1.000000e+00 : f32
    %295 = vector.broadcast %cst_99 : f32 to vector<16x32xf32>
    %296 = arith.addf %294, %295 : vector<16x32xf32>
    %cst_100 = arith.constant 5.000000e-01 : f32
    %297 = vector.broadcast %cst_100 : f32 to vector<16x32xf32>
    %298 = arith.mulf %297, %296 : vector<16x32xf32>
    %299 = arith.mulf %290, %298 : vector<16x32xf32>
    %300 = tpu.iota {dimensions = array<i32: 0>} : vector<16x1xi32>
    %c8_i32 = arith.constant 8 : i32
    %c0_i32 = arith.constant 0 : i32
    %301 = arith.cmpi eq, %c8_i32, %c0_i32 : i32
    %c1_i32 = arith.constant 1 : i32
    %302 = arith.select %301, %c1_i32, %c8_i32 : i32
    %303 = vector.broadcast %302 : i32 to vector<16x1xi32>
    %304 = arith.remsi %300, %303 : vector<16x1xi32>
    %c0_i32_101 = arith.constant 0 : i32
    %305 = vector.broadcast %c0_i32_101 : i32 to vector<16x1xi32>
    %306 = arith.cmpi ne, %304, %305 : vector<16x1xi32>
    %c0_i32_102 = arith.constant 0 : i32
    %307 = vector.broadcast %c0_i32_102 : i32 to vector<16x1xi32>
    %308 = arith.cmpi slt, %304, %307 : vector<16x1xi32>
    %c0_i32_103 = arith.constant 0 : i32
    %309 = arith.cmpi slt, %302, %c0_i32_103 : i32
    %310 = vector.broadcast %309 : i1 to vector<16x1xi1>
    %311 = vector.broadcast %310 : vector<16x1xi1> to vector<16x1xi1>
    %312 = arith.xori %308, %311 : vector<16x1xi1>
    %313 = arith.andi %312, %306 : vector<16x1xi1>
    %314 = vector.broadcast %302 : i32 to vector<16x1xi32>
    %315 = arith.addi %304, %314 : vector<16x1xi32>
    %316 = arith.select %313, %315, %304 : vector<16x1xi1>, vector<16x1xi32>
    %c3 = arith.constant 3 : index
    %c0_104 = arith.constant 0 : index
    %c0_105 = arith.constant 0 : index
    %317 = vector.load %arg18[%c3, %c0_104, %c0_105] : memref<7x1x32xf32, #tpu.memory_space<vmem>>, vector<1x1x32xf32>
    %318 = vector.shape_cast %317 : vector<1x1x32xf32> to vector<1x32xf32>
    %319 = vector.broadcast %318 : vector<1x32xf32> to vector<16x32xf32>
    %320 = arith.mulf %299, %319 : vector<16x32xf32>
    %c3_i32 = arith.constant 3 : i32
    %321 = tpu.dynamic_rotate %299 by %c3_i32 dim 0 : vector<16x32xf32>, i32 -> vector<16x32xf32>
    %c-3_i32 = arith.constant -3 : i32
    %322 = vector.broadcast %c-3_i32 : i32 to vector<16x1xi32>
    %323 = arith.addi %316, %322 : vector<16x1xi32>
    %c0_i32_106 = arith.constant 0 : i32
    %324 = vector.broadcast %c0_i32_106 : i32 to vector<16x1xi32>
    %325 = arith.cmpi sge, %323, %324 : vector<16x1xi32>
    %c-3_i32_107 = arith.constant -3 : i32
    %326 = vector.broadcast %c-3_i32_107 : i32 to vector<16x1xi32>
    %327 = arith.addi %316, %326 : vector<16x1xi32>
    %c8_i32_108 = arith.constant 8 : i32
    %328 = vector.broadcast %c8_i32_108 : i32 to vector<16x1xi32>
    %329 = arith.cmpi slt, %327, %328 : vector<16x1xi32>
    %330 = arith.andi %325, %329 : vector<16x1xi1>
    %cst_109 = arith.constant 0.000000e+00 : f32
    %331 = vector.shape_cast %330 : vector<16x1xi1> to vector<16x1xi1>
    %332 = vector.broadcast %331 : vector<16x1xi1> to vector<16x32xi1>
    %333 = vector.broadcast %cst_109 : f32 to vector<16x32xf32>
    %334 = arith.select %332, %321, %333 : vector<16x32xi1>, vector<16x32xf32>
    %c0_110 = arith.constant 0 : index
    %c0_111 = arith.constant 0 : index
    %c0_112 = arith.constant 0 : index
    %335 = vector.load %arg18[%c0_110, %c0_111, %c0_112] : memref<7x1x32xf32, #tpu.memory_space<vmem>>, vector<1x1x32xf32>
    %336 = vector.shape_cast %335 : vector<1x1x32xf32> to vector<1x32xf32>
    %337 = vector.broadcast %336 : vector<1x32xf32> to vector<16x32xf32>
    %338 = arith.mulf %334, %337 : vector<16x32xf32>
    %339 = arith.addf %320, %338 : vector<16x32xf32>
    %c2_i32 = arith.constant 2 : i32
    %340 = tpu.dynamic_rotate %299 by %c2_i32 dim 0 : vector<16x32xf32>, i32 -> vector<16x32xf32>
    %c-2_i32 = arith.constant -2 : i32
    %341 = vector.broadcast %c-2_i32 : i32 to vector<16x1xi32>
    %342 = arith.addi %316, %341 : vector<16x1xi32>
    %c0_i32_113 = arith.constant 0 : i32
    %343 = vector.broadcast %c0_i32_113 : i32 to vector<16x1xi32>
    %344 = arith.cmpi sge, %342, %343 : vector<16x1xi32>
    %c-2_i32_114 = arith.constant -2 : i32
    %345 = vector.broadcast %c-2_i32_114 : i32 to vector<16x1xi32>
    %346 = arith.addi %316, %345 : vector<16x1xi32>
    %c8_i32_115 = arith.constant 8 : i32
    %347 = vector.broadcast %c8_i32_115 : i32 to vector<16x1xi32>
    %348 = arith.cmpi slt, %346, %347 : vector<16x1xi32>
    %349 = arith.andi %344, %348 : vector<16x1xi1>
    %cst_116 = arith.constant 0.000000e+00 : f32
    %350 = vector.shape_cast %349 : vector<16x1xi1> to vector<16x1xi1>
    %351 = vector.broadcast %350 : vector<16x1xi1> to vector<16x32xi1>
    %352 = vector.broadcast %cst_116 : f32 to vector<16x32xf32>
    %353 = arith.select %351, %340, %352 : vector<16x32xi1>, vector<16x32xf32>
    %c1 = arith.constant 1 : index
    %c0_117 = arith.constant 0 : index
    %c0_118 = arith.constant 0 : index
    %354 = vector.load %arg18[%c1, %c0_117, %c0_118] : memref<7x1x32xf32, #tpu.memory_space<vmem>>, vector<1x1x32xf32>
    %355 = vector.shape_cast %354 : vector<1x1x32xf32> to vector<1x32xf32>
    %356 = vector.broadcast %355 : vector<1x32xf32> to vector<16x32xf32>
    %357 = arith.mulf %353, %356 : vector<16x32xf32>
    %358 = arith.addf %339, %357 : vector<16x32xf32>
    %c1_i32_119 = arith.constant 1 : i32
    %359 = tpu.dynamic_rotate %299 by %c1_i32_119 dim 0 : vector<16x32xf32>, i32 -> vector<16x32xf32>
    %c-1_i32 = arith.constant -1 : i32
    %360 = vector.broadcast %c-1_i32 : i32 to vector<16x1xi32>
    %361 = arith.addi %316, %360 : vector<16x1xi32>
    %c0_i32_120 = arith.constant 0 : i32
    %362 = vector.broadcast %c0_i32_120 : i32 to vector<16x1xi32>
    %363 = arith.cmpi sge, %361, %362 : vector<16x1xi32>
    %c-1_i32_121 = arith.constant -1 : i32
    %364 = vector.broadcast %c-1_i32_121 : i32 to vector<16x1xi32>
    %365 = arith.addi %316, %364 : vector<16x1xi32>
    %c8_i32_122 = arith.constant 8 : i32
    %366 = vector.broadcast %c8_i32_122 : i32 to vector<16x1xi32>
    %367 = arith.cmpi slt, %365, %366 : vector<16x1xi32>
    %368 = arith.andi %363, %367 : vector<16x1xi1>
    %cst_123 = arith.constant 0.000000e+00 : f32
    %369 = vector.shape_cast %368 : vector<16x1xi1> to vector<16x1xi1>
    %370 = vector.broadcast %369 : vector<16x1xi1> to vector<16x32xi1>
    %371 = vector.broadcast %cst_123 : f32 to vector<16x32xf32>
    %372 = arith.select %370, %359, %371 : vector<16x32xi1>, vector<16x32xf32>
    %c2 = arith.constant 2 : index
    %c0_124 = arith.constant 0 : index
    %c0_125 = arith.constant 0 : index
    %373 = vector.load %arg18[%c2, %c0_124, %c0_125] : memref<7x1x32xf32, #tpu.memory_space<vmem>>, vector<1x1x32xf32>
    %374 = vector.shape_cast %373 : vector<1x1x32xf32> to vector<1x32xf32>
    %375 = vector.broadcast %374 : vector<1x32xf32> to vector<16x32xf32>
    %376 = arith.mulf %372, %375 : vector<16x32xf32>
    %377 = arith.addf %358, %376 : vector<16x32xf32>
    %c15_i32 = arith.constant 15 : i32
    %378 = tpu.dynamic_rotate %299 by %c15_i32 dim 0 : vector<16x32xf32>, i32 -> vector<16x32xf32>
    %c1_i32_126 = arith.constant 1 : i32
    %379 = vector.broadcast %c1_i32_126 : i32 to vector<16x1xi32>
    %380 = arith.addi %316, %379 : vector<16x1xi32>
    %c0_i32_127 = arith.constant 0 : i32
    %381 = vector.broadcast %c0_i32_127 : i32 to vector<16x1xi32>
    %382 = arith.cmpi sge, %380, %381 : vector<16x1xi32>
    %c1_i32_128 = arith.constant 1 : i32
    %383 = vector.broadcast %c1_i32_128 : i32 to vector<16x1xi32>
    %384 = arith.addi %316, %383 : vector<16x1xi32>
    %c8_i32_129 = arith.constant 8 : i32
    %385 = vector.broadcast %c8_i32_129 : i32 to vector<16x1xi32>
    %386 = arith.cmpi slt, %384, %385 : vector<16x1xi32>
    %387 = arith.andi %382, %386 : vector<16x1xi1>
    %cst_130 = arith.constant 0.000000e+00 : f32
    %388 = vector.shape_cast %387 : vector<16x1xi1> to vector<16x1xi1>
    %389 = vector.broadcast %388 : vector<16x1xi1> to vector<16x32xi1>
    %390 = vector.broadcast %cst_130 : f32 to vector<16x32xf32>
    %391 = arith.select %389, %378, %390 : vector<16x32xi1>, vector<16x32xf32>
    %c4 = arith.constant 4 : index
    %c0_131 = arith.constant 0 : index
    %c0_132 = arith.constant 0 : index
    %392 = vector.load %arg18[%c4, %c0_131, %c0_132] : memref<7x1x32xf32, #tpu.memory_space<vmem>>, vector<1x1x32xf32>
    %393 = vector.shape_cast %392 : vector<1x1x32xf32> to vector<1x32xf32>
    %394 = vector.broadcast %393 : vector<1x32xf32> to vector<16x32xf32>
    %395 = arith.mulf %391, %394 : vector<16x32xf32>
    %396 = arith.addf %377, %395 : vector<16x32xf32>
    %c14_i32 = arith.constant 14 : i32
    %397 = tpu.dynamic_rotate %299 by %c14_i32 dim 0 : vector<16x32xf32>, i32 -> vector<16x32xf32>
    %c2_i32_133 = arith.constant 2 : i32
    %398 = vector.broadcast %c2_i32_133 : i32 to vector<16x1xi32>
    %399 = arith.addi %316, %398 : vector<16x1xi32>
    %c0_i32_134 = arith.constant 0 : i32
    %400 = vector.broadcast %c0_i32_134 : i32 to vector<16x1xi32>
    %401 = arith.cmpi sge, %399, %400 : vector<16x1xi32>
    %c2_i32_135 = arith.constant 2 : i32
    %402 = vector.broadcast %c2_i32_135 : i32 to vector<16x1xi32>
    %403 = arith.addi %316, %402 : vector<16x1xi32>
    %c8_i32_136 = arith.constant 8 : i32
    %404 = vector.broadcast %c8_i32_136 : i32 to vector<16x1xi32>
    %405 = arith.cmpi slt, %403, %404 : vector<16x1xi32>
    %406 = arith.andi %401, %405 : vector<16x1xi1>
    %cst_137 = arith.constant 0.000000e+00 : f32
    %407 = vector.shape_cast %406 : vector<16x1xi1> to vector<16x1xi1>
    %408 = vector.broadcast %407 : vector<16x1xi1> to vector<16x32xi1>
    %409 = vector.broadcast %cst_137 : f32 to vector<16x32xf32>
    %410 = arith.select %408, %397, %409 : vector<16x32xi1>, vector<16x32xf32>
    %c5 = arith.constant 5 : index
    %c0_138 = arith.constant 0 : index
    %c0_139 = arith.constant 0 : index
    %411 = vector.load %arg18[%c5, %c0_138, %c0_139] : memref<7x1x32xf32, #tpu.memory_space<vmem>>, vector<1x1x32xf32>
    %412 = vector.shape_cast %411 : vector<1x1x32xf32> to vector<1x32xf32>
    %413 = vector.broadcast %412 : vector<1x32xf32> to vector<16x32xf32>
    %414 = arith.mulf %410, %413 : vector<16x32xf32>
    %415 = arith.addf %396, %414 : vector<16x32xf32>
    %c13_i32 = arith.constant 13 : i32
    %416 = tpu.dynamic_rotate %299 by %c13_i32 dim 0 : vector<16x32xf32>, i32 -> vector<16x32xf32>
    %c3_i32_140 = arith.constant 3 : i32
    %417 = vector.broadcast %c3_i32_140 : i32 to vector<16x1xi32>
    %418 = arith.addi %316, %417 : vector<16x1xi32>
    %c0_i32_141 = arith.constant 0 : i32
    %419 = vector.broadcast %c0_i32_141 : i32 to vector<16x1xi32>
    %420 = arith.cmpi sge, %418, %419 : vector<16x1xi32>
    %c3_i32_142 = arith.constant 3 : i32
    %421 = vector.broadcast %c3_i32_142 : i32 to vector<16x1xi32>
    %422 = arith.addi %316, %421 : vector<16x1xi32>
    %c8_i32_143 = arith.constant 8 : i32
    %423 = vector.broadcast %c8_i32_143 : i32 to vector<16x1xi32>
    %424 = arith.cmpi slt, %422, %423 : vector<16x1xi32>
    %425 = arith.andi %420, %424 : vector<16x1xi1>
    %cst_144 = arith.constant 0.000000e+00 : f32
    %426 = vector.shape_cast %425 : vector<16x1xi1> to vector<16x1xi1>
    %427 = vector.broadcast %426 : vector<16x1xi1> to vector<16x32xi1>
    %428 = vector.broadcast %cst_144 : f32 to vector<16x32xf32>
    %429 = arith.select %427, %416, %428 : vector<16x32xi1>, vector<16x32xf32>
    %c6 = arith.constant 6 : index
    %c0_145 = arith.constant 0 : index
    %c0_146 = arith.constant 0 : index
    %430 = vector.load %arg18[%c6, %c0_145, %c0_146] : memref<7x1x32xf32, #tpu.memory_space<vmem>>, vector<1x1x32xf32>
    %431 = vector.shape_cast %430 : vector<1x1x32xf32> to vector<1x32xf32>
    %432 = vector.broadcast %431 : vector<1x32xf32> to vector<16x32xf32>
    %433 = arith.mulf %429, %432 : vector<16x32xf32>
    %434 = arith.addf %415, %433 : vector<16x32xf32>
    %c0_147 = arith.constant 0 : index
    %c0_148 = arith.constant 0 : index
    %435 = vector.load %arg19[%c0_147, %c0_148] : memref<1x32xf32, #tpu.memory_space<vmem>>, vector<1x32xf32>
    %436 = vector.broadcast %435 : vector<1x32xf32> to vector<16x32xf32>
    %437 = arith.addf %434, %436 : vector<16x32xf32>
    %c0_149 = arith.constant 0 : index
    %c0_150 = arith.constant 0 : index
    %438 = vector.load %arg21[%c0_149, %c0_150] : memref<16x32xf32, #tpu.memory_space<vmem>>, vector<16x32xf32>
    tpu.vector_store %arg21[%c0_149, %c0_150], %437 {strides = array<i32>} : memref<16x32xf32, #tpu.memory_space<vmem>>, vector<16x32xf32>,
    return
  }
  func.func @transform_0(%arg0: i32) -> (i32, i32) {
    %c0_i32 = arith.constant 0 : i32
    %c0_i32_0 = arith.constant 0 : i32
    return %arg0, %c0_i32 : i32, i32
  }
  func.func @transform_1(%arg0: i32) -> (i32, i32) {
    %c0_i32 = arith.constant 0 : i32
    %c0_i32_0 = arith.constant 0 : i32
    %c0_i32_1 = arith.constant 0 : i32
    return %c0_i32, %c0_i32_0 : i32, i32
  }
  func.func @transform_2(%arg0: i32) -> (i32, i32) {
    %c0_i32 = arith.constant 0 : i32
    %c0_i32_0 = arith.constant 0 : i32
    %c0_i32_1 = arith.constant 0 : i32
    return %c0_i32, %c0_i32_0 : i32, i32
  }
  func.func @transform_3(%arg0: i32) -> (i32, i32) {
    %c0_i32 = arith.constant 0 : i32
    %c0_i32_0 = arith.constant 0 : i32
    %c0_i32_1 = arith.constant 0 : i32
    return %c0_i32, %c0_i32_0 : i32, i32
  }
  func.func @transform_4(%arg0: i32) -> (i32, i32) {
    %c0_i32 = arith.constant 0 : i32
    %c0_i32_0 = arith.constant 0 : i32
    %c0_i32_1 = arith.constant 0 : i32
    return %c0_i32, %c0_i32_0 : i32, i32
  }
  func.func @transform_5(%arg0: i32) -> (i32, i32) {
    %c0_i32 = arith.constant 0 : i32
    %c0_i32_0 = arith.constant 0 : i32
    %c0_i32_1 = arith.constant 0 : i32
    return %c0_i32, %c0_i32_0 : i32, i32
  }
  func.func @transform_6(%arg0: i32) -> (i32, i32) {
    %c0_i32 = arith.constant 0 : i32
    %c0_i32_0 = arith.constant 0 : i32
    %c0_i32_1 = arith.constant 0 : i32
    return %c0_i32, %c0_i32_0 : i32, i32
  }
  func.func @transform_7(%arg0: i32) -> (i32, i32) {
    %c0_i32 = arith.constant 0 : i32
    %c0_i32_0 = arith.constant 0 : i32
    %c0_i32_1 = arith.constant 0 : i32
    return %c0_i32, %c0_i32_0 : i32, i32
  }
  func.func @transform_8(%arg0: i32) -> (i32, i32) {
    %c0_i32 = arith.constant 0 : i32
    %c0_i32_0 = arith.constant 0 : i32
    %c0_i32_1 = arith.constant 0 : i32
    return %c0_i32, %c0_i32_0 : i32, i32
  }
  func.func @transform_9(%arg0: i32) -> (i32, i32) {
    %c0_i32 = arith.constant 0 : i32
    %c0_i32_0 = arith.constant 0 : i32
    %c0_i32_1 = arith.constant 0 : i32
    return %c0_i32, %c0_i32_0 : i32, i32
  }
  func.func @transform_10(%arg0: i32) -> (i32, i32) {
    %c0_i32 = arith.constant 0 : i32
    %c0_i32_0 = arith.constant 0 : i32
    %c0_i32_1 = arith.constant 0 : i32
    return %c0_i32, %c0_i32_0 : i32, i32
  }
  func.func @transform_11(%arg0: i32) -> (i32, i32) {
    %c0_i32 = arith.constant 0 : i32
    %c0_i32_0 = arith.constant 0 : i32
    %c0_i32_1 = arith.constant 0 : i32
    return %c0_i32, %c0_i32_0 : i32, i32
  }
  func.func @transform_12(%arg0: i32) -> (i32, i32) {
    %c0_i32 = arith.constant 0 : i32
    %c0_i32_0 = arith.constant 0 : i32
    %c0_i32_1 = arith.constant 0 : i32
    return %c0_i32, %c0_i32_0 : i32, i32
  }
  func.func @transform_13(%arg0: i32) -> (i32, i32) {
    %c0_i32 = arith.constant 0 : i32
    %c0_i32_0 = arith.constant 0 : i32
    %c0_i32_1 = arith.constant 0 : i32
    return %c0_i32, %c0_i32_0 : i32, i32
  }
  func.func @transform_14(%arg0: i32) -> (i32, i32) {
    %c0_i32 = arith.constant 0 : i32
    %c0_i32_0 = arith.constant 0 : i32
    %c0_i32_1 = arith.constant 0 : i32
    return %c0_i32, %c0_i32_0 : i32, i32
  }
  func.func @transform_15(%arg0: i32) -> (i32, i32) {
    %c0_i32 = arith.constant 0 : i32
    %c0_i32_0 = arith.constant 0 : i32
    %c0_i32_1 = arith.constant 0 : i32
    return %c0_i32, %c0_i32_0 : i32, i32
  }
  func.func @transform_16(%arg0: i32) -> (i32, i32) {
    %c0_i32 = arith.constant 0 : i32
    %c0_i32_0 = arith.constant 0 : i32
    %c0_i32_1 = arith.constant 0 : i32
    return %c0_i32, %c0_i32_0 : i32, i32
  }
  func.func @transform_17(%arg0: i32) -> (i32, i32, i32) {
    %c0_i32 = arith.constant 0 : i32
    %c0_i32_0 = arith.constant 0 : i32
    %c0_i32_1 = arith.constant 0 : i32
    %c0_i32_2 = arith.constant 0 : i32
    return %c0_i32, %c0_i32_0, %c0_i32_1 : i32, i32, i32
  }
  func.func @transform_18(%arg0: i32) -> (i32, i32) {
    %c0_i32 = arith.constant 0 : i32
    %c0_i32_0 = arith.constant 0 : i32
    %c0_i32_1 = arith.constant 0 : i32
    return %c0_i32, %c0_i32_0 : i32, i32
  }
  func.func @transform_19(%arg0: i32) -> (i32, i32) {
    %c0_i32 = arith.constant 0 : i32
    %c0_i32_0 = arith.constant 0 : i32
    return %arg0, %c0_i32 : i32, i32
  }
  func.func @transform_20(%arg0: i32) -> (i32, i32) {
    %c0_i32 = arith.constant 0 : i32
    %c0_i32_0 = arith.constant 0 : i32
    return %arg0, %c0_i32 : i32, i32
  }
}

</mosaic_0001>

<bundles_post_ra>
// kernel: tpu_custom_call.1
= control target key start
LH: loop header
LB: loop body
LE: loop exit
PB: predicated region body
PF: predicated region fallthrough
CT: control target
= control target key end

     0   :  { %s4551_s0 = inlined_call_operand.vmem [shape: f32[32,32], index: 0, kind: input, shape index: {}]   ;;  %s4552_s1 = inlined_call_operand.vmem [shape: f32[1,32], index: 1, kind: input, shape index: {}]   ;;  %s4553_s2 = inlined_call_operand.hbm [shape: f32[1,32], index: 2, kind: input, shape index: {}]   ;;  %s4554_s3 = inlined_call_operand.vmem [shape: bf16[32,64], index: 3, kind: input, shape index: {}]   ;;  %s4555_s4 = inlined_call_operand.hbm [shape: f32[1,64], index: 4, kind: input, shape index: {}]   ;;  %s4556_s5 = inlined_call_operand.vmem [shape: bf16[64,32], index: 5, kind: input, shape index: {}]   ;;  %s4557_s6 = inlined_call_operand.hbm [shape: f32[1,32], index: 6, kind: input, shape index: {}]   ;;  %s4558_s7 = inlined_call_operand.hbm [shape: f32[1,32], index: 7, kind: input, shape index: {}]   ;;  %s4559_s8 = inlined_call_operand.hbm [shape: f32[1,32], index: 8, kind: input, shape index: {}]   ;;  %s4560_s9 = inlined_call_operand.vmem [shape: bf16[32,96], index: 9, kind: input, shape index: {}]   ;;  %s4561_s10 = inlined_call_operand.hbm [shape: f32[1,96], index: 10, kind: input, shape index: {}]   ;;  %s4562_s11 = inlined_call_operand.hbm [shape: bf16[32,32], index: 11, kind: input, shape index: {}]   ;;  %s4563_s12 = inlined_call_operand.hbm [shape: f32[1,32], index: 12, kind: input, shape index: {}]   ;;  %s4564_s13 = inlined_call_operand.hbm [shape: f32[1,32], index: 13, kind: input, shape index: {}]   ;;  %s4565_s14 = inlined_call_operand.hbm [shape: f32[1,32], index: 14, kind: input, shape index: {}]   ;;  %s4566_s15 = inlined_call_operand.vmem [shape: bf16[32,64], index: 15, kind: input, shape index: {}]   ;;  %s4567_s16 = inlined_call_operand.vmem [shape: f32[1,64], index: 16, kind: input, shape index: {}]   ;;  %s4568_s17 = inlined_call_operand.vmem [shape: f32[7,1,32], index: 17, kind: input, shape index: {}]   ;;  %s4569_s18 = inlined_call_operand.vmem [shape: f32[1,32], index: 18, kind: input, shape index: {}]   ;;  %s4570_s19 = inlined_call_operand.hbm [shape: f32[32,32], index: 19, kind: output, shape index: {0}]   ;;  %s4571_s20 = inlined_call_operand.hbm [shape: f32[32,32], index: 20, kind: output, shape index: {1}]  }
   0x1   :  { %4589 = sst [smem:[#allocation36_spill]] %s4551_s0 }
   0x2   :  { %4590 = sst [smem:[#allocation37_spill]] %s4552_s1 }
   0x3   :  { %4591 = sst [smem:[#allocation38_spill]] %s4553_s2 }
   0x4   :  { %4592 = sst [smem:[#allocation39_spill]] %s4554_s3 }
   0x5   :  { %4593 = sst [smem:[#allocation40_spill]] %s4555_s4 }
   0x6   :  { %4594 = sst [smem:[#allocation41_spill]] %s4557_s6 }
   0x7   :  { %4595 = sst [smem:[#allocation42_spill]] %s4558_s7 }
   0x8   :  { %4596 = sst [smem:[#allocation43_spill]] %s4568_s17 }
   0x9   :  { %4597 = sst [smem:[#allocation44_spill]] %s4569_s18 }
   0xa   :  { %4598 = sst [smem:[#allocation45_spill]] %s4570_s19 }
   0xb   :  { %4599 = sst [smem:[#allocation46_spill]] %s4571_s20 }
   0xc   :  { %26 = vsyncpa [#allocation3], 0 }
   0xd   :  { %27 = vsyncpa [#allocation6], 0 }
   0xe   :  { %28 = vsyncpa [#allocation9], 0 }
   0xf   :  { %29 = vsyncpa [#allocation12], 0 }
  0x10   :  { %30 = vsyncpa [#allocation15], 0 }
  0x11   :  { %31 = vsyncpa [#allocation18], 0 }
  0x12   :  { %32 = vsyncpa [#allocation4], 0 }
  0x13   :  { %34 = vsyncpa [#allocation4 + $0x1], 0 }
  0x14   :  { %35 = vsyncpa [#allocation21], 0 }
  0x15   :  { %37 = vsyncpa [#allocation21 + $0x1], 0  ;;  %s3747_s1 = smov 0   ;;  %s3749_s22 = smov 0  }
  0x16   :  { %s3751_s23 = smov 0   ;;  %s3753_s24 = smov 0  }
  0x17 LB: > { %4600 = sst [smem:[#allocation30_spill]] %s3597_s1  ;;  %s3768_s2 = sadd.s32 4294967295, %s3609_s24   ;;  %s3609_s24 = sphi %s3753_s24, %s4643_s24   ;;  %s3605_s23 = sphi %s3751_s23, %s4648_s23   ;;  %s3601_s22 = sphi %s3749_s22, %s4647_s22   ;;  %s3597_s1 = sphi %s3747_s1, %s4646_s1  }
  0x18   : > { %4601 = sst [smem:[#allocation31_spill]] %s3605_s23  ;;  %s2683_s25 = sadd.s32 4294967294, %s3609_s24  }
  0x19   : > { %4602 = sst [smem:[#allocation32_spill]] %s3609_s24  ;;  %s3772_s3 = sadd.s32 1, %s3609_s24  }
  0x1a   : > { %4603 = sst [smem:[#allocation33_spill]] %s3772_s3  ;;  %s454_s26 = sadd.s32 1, %s3605_s23 }
  0x1b   : > { %s451_s27 = ssub.s32 %s3609_s24, %s3772_s3  ;;  %p464_p0 = scmp.ne.s32.totalorder %s3605_s23, %s3601_s22 }
  0x1c   : > { %p452_p1 = scmp.eq.s32.totalorder %s451_s27, 0  ;;  %p465_p2 = scmp.eq.s32.totalorder %s3768_s2, 1 }
  0x1d   : > { %p470_p3 = scmp.ne.s32.totalorder %s3601_s22, %s3597_s1  ;;  %p471_p4 = scmp.eq.s32.totalorder %s2683_s25, 1 }
  0x1e   : > { %s3783_s28 = scalar_select %p452_p1, %s3605_s23, %s454_s26  }
  0x1f   : > { %p3785_p5 = por %p465_p2, %p464_p0  ;;  %p3789_p6 = por %p471_p4, %p470_p3 }
  0x20   : > { %4604 = sst [smem:[#allocation34_spill]] %s3783_s28  ;;  %p2684_p7 = scmp.ge.s32.totalorder %s3609_s24, 1 }
  0x21   : > { %s4605_s4 = scalar_select %p3785_p5, 1, 0 }
  0x22   : > { %s4606_s29 = scalar_select %p3789_p6, 1, 0 }
  0x23   : > { %p504_p8 = scmp.lt.s32.totalorder %s3609_s24, 3  ;;  %p4582_p9 = scmp.eq.s32.totalorder %s3768_s2, 0 }
  0x24   : > { %4607 = sst [smem:[#allocation35_spill]] %s4606_s29  ;;  %s3611_s0 = smov [#allocation5]  }
  0x25   : > { %p3796_p10 = pnand %p2684_p7, %p504_p8  ;;  %s534_s21 = sshll.u32 %s3611_s0, 4  ;;  %s535_s21 = int_to_ptr.vmem [resolvable:$true] %s534_s21 }
  0x26   : > { %s3612_s25 = smov [#allocation8]   ;;  %s3613_s28 = smov [#allocation11]  }
  0x27   : > { %s4608_s30 = scalar_select %p3796_p10, 1, 0 }
  0x28   : > { %p3012_p11 = pneg %p3796_p10  ;;  %s559_s26 = sshll.u32 %s3612_s25, 4  ;;  %s3808_s26 = int_to_ptr.vmem [resolvable:$true] %s559_s26 }
  0x29   : > { %s584_s23 = sshll.u32 %s3613_s28, 4  ;;  %s4610_s0 = sld [smem:[#allocation40_spill]]  ;;  %s3810_s23 = int_to_ptr.vmem [resolvable:$true] %s584_s23 }
  0x2a   : > { %p3804_p12 = pnand %p4582_p9, %p3012_p11 }
  0x2c   : > { %p3820_p0 = pneg %p3804_p12 }
  0x2f   : > { %s3211_s1 = scalar_lea.hbm %s4610_s0, 16 }
  0x30   : > { %p3212_p13 = scmp.ne.s32.totalorder %s4610_s0, %s3211_s1  ;;  %p3218_p3 = scmp.lt.u32.totalorder %s3211_s1, %s4610_s0 }
  0x32   : > { %p3214_p1 = pnand %p3820_p0, %p3212_p13 }
  0x34   : > { %p3215_p2 = pneg %p3214_p1 }
  0x36   : > { %p3220_p4 = pnand %p3218_p3, %p3215_p2 }
  0x38   : > { %3223 = shalt.err (!%p3220_p4)
}
  0x39   : > { %s3224_s3 = scalar_lea.vmem %s535_s21, 16  ;;  %s3231_s20 = scalar_lea.vmem %s535_s21, 32 }
  0x3a   : > { %p3225_p7 = scmp.ne.s32.totalorder %s535_s21, %s3224_s3  ;;  %p3232_p9 = scmp.lt.s32.totalorder %s535_s21, %s535_s21 }
  0x3b   : > { %p3233_p6 = scmp.lt.s32.totalorder %s3231_s20, %s3224_s3 }
  0x3c   : > { %p3227_p8 = pnand %p3225_p7, %p3820_p0 }
  0x3d   : > { %p3234_p5 = por %p3233_p6, %p3232_p9 }
  0x3e   : > { %p3228_p11 = pneg %p3227_p8 }
  0x40   : > { %p3235_p10 = pnand %p3234_p5, %p3228_p11 }
  0x42   : > { %3238 = shalt.err (!%p3235_p10)
}
  0x43   : > { %3018 = dma.hbm_to_vmem [thread:$0]  (!%p3804_p12), %s4610_s0, 16, %s535_s21, [#allocation6]  }
  0x44   : > { %s4612_s7 = sld [smem:[#allocation42_spill]] }
  0x4a   : > { %s3239_s28 = scalar_lea.hbm %s4612_s7, 16 }
  0x4b   : > { %p3240_p13 = scmp.ne.s32.totalorder %s4612_s7, %s3239_s28  ;;  %p3246_p5 = scmp.lt.u32.totalorder %s3239_s28, %s4612_s7 }
  0x4d   : > { %p3242_p1 = pnand %p3240_p13, %p3820_p0 }
  0x4f   : > { %p3243_p6 = pneg %p3242_p1 }
  0x51   : > { %p3248_p9 = pnand %p3246_p5, %p3243_p6 }
  0x53   : > { %3251 = shalt.err (!%p3248_p9)
}
  0x54   : > { %s3252_s21 = scalar_lea.vmem %s3808_s26, 16  ;;  %s3259_s17 = scalar_lea.vmem %s3808_s26, 32 }
  0x55   : > { %p3253_p10 = scmp.ne.s32.totalorder %s3808_s26, %s3252_s21  ;;  %p3260_p4 = scmp.lt.s32.totalorder %s3808_s26, %s3808_s26 }
  0x56   : > { %p3261_p7 = scmp.lt.s32.totalorder %s3259_s17, %s3252_s21 }
  0x57   : > { %p3255_p2 = pnand %p3253_p10, %p3820_p0 }
  0x58   : > { %p3262_p8 = por %p3261_p7, %p3260_p4 }
  0x59   : > { %p3256_p3 = pneg %p3255_p2 }
  0x5b   : > { %p3263_p11 = pnand %p3262_p8, %p3256_p3 }
  0x5d   : > { %3266 = shalt.err (!%p3263_p11)
}
  0x5e   : > { %3024 = dma.hbm_to_vmem [thread:$0]  (!%p3804_p12), %s4612_s7, 16, %s3808_s26, [#allocation9]  }
  0x5f   : > { %s3267_s1 = scalar_lea.hbm %s4561_s10, 16 }
  0x60   : > { %p3268_p13 = scmp.ne.s32.totalorder %s4561_s10, %s3267_s1  ;;  %p3274_p5 = scmp.lt.u32.totalorder %s3267_s1, %s4561_s10 }
  0x62   : > { %p3270_p1 = pnand %p3268_p13, %p3820_p0 }
  0x64   : > { %p3271_p6 = pneg %p3270_p1 }
  0x66   : > { %p3276_p9 = pnand %p3274_p5, %p3271_p6 }
  0x68   : > { %3279 = shalt.err (!%p3276_p9)
}
  0x69   : > { %s3280_s26 = scalar_lea.vmem %s3810_s23, 16  ;;  %s3287_s17 = scalar_lea.vmem %s3810_s23, 32 }
  0x6a   : > { %p3281_p10 = scmp.ne.s32.totalorder %s3810_s23, %s3280_s26  ;;  %p3288_p4 = scmp.lt.s32.totalorder %s3810_s23, %s3810_s23 }
  0x6b   : > { %p3289_p7 = scmp.lt.s32.totalorder %s3287_s17, %s3280_s26 }
  0x6c   : > { %p3283_p2 = pnand %p3281_p10, %p3820_p0 }
  0x6d   : > { %p3290_p8 = por %p3289_p7, %p3288_p4 }
  0x6e   : > { %p3284_p3 = pneg %p3283_p2 }
  0x70   : > { %p3291_p11 = pnand %p3290_p8, %p3284_p3 }
  0x72   : > { %3294 = shalt.err (!%p3291_p11)
}
  0x73   : > { %3030 = dma.hbm_to_vmem [thread:$0]  (!%p3804_p12), %s4561_s10, 16, %s3810_s23, [#allocation12]  }
  0x74   : > { %s3614_s29 = smov [#allocation14]   ;;  %s3615_s1 = smov [#allocation2]  }
  0x75   : > { %s608_s18 = sshll.u32 %s3614_s29, 4  ;;  %s520_s28 = sshll.u32 %s3615_s1, 4  ;;  %s609_s18 = int_to_ptr.vmem [resolvable:$true] %s608_s18  ;;  %s521_s28 = int_to_ptr.vmem [resolvable:$true] %s520_s28 }
  0x76   : > { %s3295_s21 = scalar_lea.hbm %s4563_s12, 16 }
  0x77   : > { %p3296_p13 = scmp.ne.s32.totalorder %s4563_s12, %s3295_s21  ;;  %p3302_p5 = scmp.lt.u32.totalorder %s3295_s21, %s4563_s12 }
  0x79   : > { %p3298_p1 = pnand %p3296_p13, %p3820_p0 }
  0x7b   : > { %p3299_p6 = pneg %p3298_p1 }
  0x7d   : > { %p3304_p9 = pnand %p3302_p5, %p3299_p6 }
  0x7f   : > { %3307 = shalt.err (!%p3304_p9)
}
  0x80   : > { %s3308_s23 = scalar_lea.vmem %s609_s18, 16  ;;  %s3315_s24 = scalar_lea.vmem %s609_s18, 32 }
  0x81   : > { %p3309_p10 = scmp.ne.s32.totalorder %s609_s18, %s3308_s23  ;;  %p3316_p4 = scmp.lt.s32.totalorder %s609_s18, %s609_s18 }
  0x82   : > { %p3317_p7 = scmp.lt.s32.totalorder %s3315_s24, %s3308_s23 }
  0x83   : > { %p3311_p2 = pnand %p3309_p10, %p3820_p0 }
  0x84   : > { %p3318_p8 = por %p3317_p7, %p3316_p4 }
  0x85   : > { %p3312_p3 = pneg %p3311_p2 }
  0x87   : > { %p3319_p11 = pnand %p3318_p8, %p3312_p3 }
  0x89   : > { %3322 = shalt.err (!%p3319_p11)
}
  0x8a   : > { %3036 = dma.hbm_to_vmem [thread:$0]  (!%p3804_p12), %s4563_s12, 16, %s609_s18, [#allocation15]  }
  0x8b   : > { %s4613_s20 = sld [smem:[#allocation38_spill]] }
  0x91   : > { %s3323_s21 = scalar_lea.hbm %s4613_s20, 16 }
  0x92   : > { %p3324_p13 = scmp.ne.s32.totalorder %s4613_s20, %s3323_s21  ;;  %p3330_p5 = scmp.lt.u32.totalorder %s3323_s21, %s4613_s20 }
  0x94   : > { %p3326_p1 = pnand %p3324_p13, %p3820_p0 }
  0x96   : > { %p3327_p6 = pneg %p3326_p1 }
  0x98   : > { %p3332_p9 = pnand %p3330_p5, %p3327_p6 }
  0x9a   : > { %3335 = shalt.err (!%p3332_p9)
}
  0x9b   : > { %s3336_s24 = scalar_lea.vmem %s521_s28, 16  ;;  %s3343_s18 = scalar_lea.vmem %s521_s28, 32 }
  0x9c   : > { %p3337_p10 = scmp.ne.s32.totalorder %s521_s28, %s3336_s24  ;;  %p3344_p4 = scmp.lt.s32.totalorder %s521_s28, %s521_s28 }
  0x9d   : > { %p3345_p7 = scmp.lt.s32.totalorder %s3343_s18, %s3336_s24 }
  0x9e   : > { %p3339_p2 = pnand %p3337_p10, %p3820_p0 }
  0x9f   : > { %p3346_p8 = por %p3345_p7, %p3344_p4 }
  0xa0   : > { %p3340_p3 = pneg %p3339_p2 }
  0xa2   : > { %p3347_p11 = pnand %p3346_p8, %p3340_p3 }
  0xa4   : > { %3350 = shalt.err (!%p3347_p11)
}
  0xa5   : > { %3015 = dma.hbm_to_vmem [thread:$0]  (!%p3804_p12), %s4613_s20, 16, %s521_s28, [#allocation3]  }
  0xa6   : > { %s3616_s0 = smov [#allocation7]   ;;  %s3617_s21 = smov [#allocation10]  }
  0xa7   : > { %s548_s3 = sshll.u32 %s3616_s0, 4  ;;  %s570_s26 = sshll.u32 %s3617_s21, 4  ;;  %s549_s3 = int_to_ptr.vmem [resolvable:$true] %s548_s3  ;;  %s571_s26 = int_to_ptr.vmem [resolvable:$true] %s570_s26 }
  0xa8   : > { %s4614_s6 = sld [smem:[#allocation41_spill]] }
  0xae   : > { %s3351_s23 = scalar_lea.hbm %s4614_s6, 16 }
  0xaf   : > { %p3352_p13 = scmp.ne.s32.totalorder %s4614_s6, %s3351_s23  ;;  %p3358_p5 = scmp.lt.u32.totalorder %s3351_s23, %s4614_s6 }
  0xb1   : > { %p3354_p1 = pnand %p3352_p13, %p3820_p0 }
  0xb3   : > { %p3355_p6 = pneg %p3354_p1 }
  0xb5   : > { %p3360_p9 = pnand %p3358_p5, %p3355_p6 }
  0xb7   : > { %3363 = shalt.err (!%p3360_p9)
}
  0xb8   : > { %s3364_s28 = scalar_lea.vmem %s549_s3, 16  ;;  %s3371_s1 = scalar_lea.vmem %s549_s3, 32 }
  0xb9   : > { %p3365_p10 = scmp.ne.s32.totalorder %s549_s3, %s3364_s28  ;;  %p3372_p4 = scmp.lt.s32.totalorder %s549_s3, %s549_s3 }
  0xba   : > { %p3373_p7 = scmp.lt.s32.totalorder %s3371_s1, %s3364_s28 }
  0xbb   : > { %p3367_p2 = pnand %p3365_p10, %p3820_p0 }
  0xbc   : > { %p3374_p8 = por %p3373_p7, %p3372_p4 }
  0xbd   : > { %p3368_p3 = pneg %p3367_p2 }
  0xbf   : > { %p3375_p11 = pnand %p3374_p8, %p3368_p3 }
  0xc1   : > { %3378 = shalt.err (!%p3375_p11)
}
  0xc2   : > { %3021 = dma.hbm_to_vmem [thread:$0]  (!%p3804_p12), %s4614_s6, 16, %s549_s3, [#allocation6]  }
  0xc3   : > { %s3379_s19 = scalar_lea.hbm %s4559_s8, 16 }
  0xc4   : > { %p3380_p13 = scmp.ne.s32.totalorder %s4559_s8, %s3379_s19  ;;  %p3386_p5 = scmp.lt.u32.totalorder %s3379_s19, %s4559_s8 }
  0xc6   : > { %p3382_p1 = pnand %p3380_p13, %p3820_p0 }
  0xc8   : > { %p3383_p6 = pneg %p3382_p1 }
  0xca   : > { %p3388_p9 = pnand %p3386_p5, %p3383_p6 }
  0xcc   : > { %3391 = shalt.err (!%p3388_p9)
}
  0xcd   : > { %s3392_s28 = scalar_lea.vmem %s571_s26, 16  ;;  %s3399_s3 = scalar_lea.vmem %s571_s26, 32 }
  0xce   : > { %p3393_p10 = scmp.ne.s32.totalorder %s571_s26, %s3392_s28  ;;  %p3400_p4 = scmp.lt.s32.totalorder %s571_s26, %s571_s26 }
  0xcf   : > { %p3401_p7 = scmp.lt.s32.totalorder %s3399_s3, %s3392_s28 }
  0xd0   : > { %p3395_p2 = pnand %p3393_p10, %p3820_p0 }
  0xd1   : > { %p3402_p8 = por %p3401_p7, %p3400_p4 }
  0xd2   : > { %p3396_p3 = pneg %p3395_p2 }
  0xd4   : > { %p3403_p11 = pnand %p3402_p8, %p3396_p3 }
  0xd6   : > { %3406 = shalt.err (!%p3403_p11)
}
  0xd7   : > { %3027 = dma.hbm_to_vmem [thread:$0]  (!%p3804_p12), %s4559_s8, 16, %s571_s26, [#allocation9]  }
  0xd8   : > { %s3618_s21 = smov [#allocation13]   ;;  %s3407_s23 = scalar_lea.hbm %s4562_s11, 256 }
  0xd9   : > { %s594_s7 = sshll.u32 %s3618_s21, 4  ;;  %p3408_p13 = scmp.ne.s32.totalorder %s4562_s11, %s3407_s23  ;;  %s595_s7 = int_to_ptr.vmem [resolvable:$true] %s594_s7 }
  0xda   : > { %p3414_p5 = scmp.lt.u32.totalorder %s3407_s23, %s4562_s11 }
  0xdb   : > { %p3410_p1 = pnand %p3408_p13, %p3820_p0 }
  0xdd   : > { %p3411_p6 = pneg %p3410_p1 }
  0xdf   : > { %p3416_p9 = pnand %p3414_p5, %p3411_p6 }
  0xe1   : > { %3419 = shalt.err (!%p3416_p9)
}
  0xe2   : > { %s3420_s26 = scalar_lea.vmem %s595_s7, 256  ;;  %p3428_p4 = scmp.lt.s32.totalorder %s595_s7, %s595_s7 }
  0xe3   : > { %p3421_p10 = scmp.ne.s32.totalorder %s595_s7, %s3420_s26  ;;  %p3429_p7 = scmp.lt.s32.totalorder %s3420_s26, %s3420_s26 }
  0xe5   : > { %p3423_p2 = pnand %p3421_p10, %p3820_p0  ;;  %p3430_p8 = por %p3429_p7, %p3428_p4 }
  0xe7   : > { %p3424_p3 = pneg %p3423_p2 }
  0xe9   : > { %p3431_p11 = pnand %p3430_p8, %p3424_p3 }
  0xeb   : > { %3434 = shalt.err (!%p3431_p11)
}
  0xec   : > { %s3619_s3 = smov 64   ;;  %s3620_s1 = smov 4  }
  0xed   : > { %3033 = dma.hbm_to_vmem [thread:$0]  (!%p3804_p12), %s4562_s11, 256, %s595_s7, [#allocation12], %s3619_s3, %s3619_s3, %s3620_s1  }
  0xee   : > { %s3621_s17 = smov [#allocation16]   ;;  %s3622_s23 = smov [#allocation17]  }
  0xef   : > { %s619_s19 = sshll.u32 %s3621_s17, 4  ;;  %s630_s24 = sshll.u32 %s3622_s23, 4  ;;  %s620_s19 = int_to_ptr.vmem [resolvable:$true] %s619_s19  ;;  %s3974_s24 = int_to_ptr.vmem [resolvable:$true] %s630_s24 }
  0xf0   : > { %s3435_s28 = scalar_lea.hbm %s4564_s13, 16 }
  0xf1   : > { %p3436_p13 = scmp.ne.s32.totalorder %s4564_s13, %s3435_s28  ;;  %p3442_p5 = scmp.lt.u32.totalorder %s3435_s28, %s4564_s13 }
  0xf3   : > { %p3438_p1 = pnand %p3436_p13, %p3820_p0 }
  0xf5   : > { %p3439_p6 = pneg %p3438_p1 }
  0xf7   : > { %p3444_p9 = pnand %p3442_p5, %p3439_p6 }
  0xf9   : > { %3447 = shalt.err (!%p3444_p9)
}
  0xfa   : > { %s3448_s3 = scalar_lea.vmem %s620_s19, 16  ;;  %s3455_s1 = scalar_lea.vmem %s620_s19, 32 }
  0xfb   : > { %p3449_p10 = scmp.ne.s32.totalorder %s620_s19, %s3448_s3  ;;  %p3456_p4 = scmp.lt.s32.totalorder %s620_s19, %s620_s19 }
  0xfc   : > { %p3457_p7 = scmp.lt.s32.totalorder %s3455_s1, %s3448_s3 }
  0xfd   : > { %p3451_p2 = pnand %p3449_p10, %p3820_p0 }
  0xfe   : > { %p3458_p8 = por %p3457_p7, %p3456_p4 }
  0xff   : > { %p3452_p3 = pneg %p3451_p2 }
 0x101   : > { %p3459_p11 = pnand %p3458_p8, %p3452_p3 }
 0x103   : > { %3462 = shalt.err (!%p3459_p11)
}
 0x104   : > { %3039 = dma.hbm_to_vmem [thread:$0]  (!%p3804_p12), %s4564_s13, 16, %s620_s19, [#allocation15]  }
 0x105   : > { %s3463_s18 = scalar_lea.hbm %s4565_s14, 16 }
 0x106   : > { %p3464_p13 = scmp.ne.s32.totalorder %s4565_s14, %s3463_s18  ;;  %p3470_p5 = scmp.lt.u32.totalorder %s3463_s18, %s4565_s14 }
 0x108   : > { %p3466_p1 = pnand %p3464_p13, %p3820_p0 }
 0x10a   : > { %p3467_p6 = pneg %p3466_p1 }
 0x10c   : > { %p3472_p9 = pnand %p3470_p5, %p3467_p6 }
 0x10e   : > { %3475 = shalt.err (!%p3472_p9)
}
 0x10f   : > { %s3476_s19 = scalar_lea.vmem %s3974_s24, 16  ;;  %s3483_s7 = scalar_lea.vmem %s3974_s24, 32 }
 0x110   : > { %p3477_p10 = scmp.ne.s32.totalorder %s3974_s24, %s3476_s19  ;;  %p3484_p4 = scmp.lt.s32.totalorder %s3974_s24, %s3974_s24 }
 0x111   : > { %p3485_p7 = scmp.lt.s32.totalorder %s3483_s7, %s3476_s19 }
 0x112   : > { %p3479_p2 = pnand %p3477_p10, %p3820_p0 }
 0x113   : > { %p3486_p8 = por %p3485_p7, %p3484_p4 }
 0x114   : > { %p3480_p3 = pneg %p3479_p2 }
 0x116   : > { %p3487_p11 = pnand %p3486_p8, %p3480_p3 }
 0x118   : > { %3490 = shalt.err (!%p3487_p11)
}
 0x119   : > { %3042 = dma.hbm_to_vmem [thread:$0]  (!%p3804_p12), %s4565_s14, 16, %s3974_s24, [#allocation18]  }
 0x11a   : > { %p4615_p13 = scmp.ne.s32.totalorder %s4608_s30, 0 }
 0x11b   : > { %p4616_p0 = scmp.eq.s32.totalorder (!%p4615_p13), %s3768_s2, 0 }
 0x11c   : > { %664 = sbr.rel (%p4615_p13) target bundleno = 3651 (0xe43), region = 96 }
 0x123   : > { %3564 = dma.done.wait (%p4616_p0), [#allocation3], 16   ;;  %p4617_p1 = pmov %p4616_p0 }
 0x124   : > { %p4618_p6 = pmov %p4616_p0 }
 0x125   : > { %3566 = vsyncadd (%p4617_p1), [#allocation3], 4294967280 }
 0x126   : > { %3568 = dma.done.wait (%p4618_p6), [#allocation6], 32   ;;  %p4619_p5 = pmov %p4616_p0 }
 0x127   : > { %p4620_p9 = pmov %p4616_p0 }
 0x128   : > { %3570 = vsyncadd (%p4619_p5), [#allocation6], 4294967264 }
 0x129   : > { %3572 = dma.done.wait (%p4620_p9), [#allocation9], 32   ;;  %p4621_p12 = pmov %p4616_p0 }
 0x12a   : > { %p4622_p10 = pmov %p4616_p0 }
 0x12b   : > { %3574 = vsyncadd (%p4621_p12), [#allocation9], 4294967264 }
 0x12c   : > { %3576 = dma.done.wait (%p4622_p10), [#allocation12], 272   ;;  %p4623_p2 = pmov %p4616_p0 }
 0x12d   : > { %p4624_p3 = pmov %p4616_p0 }
 0x12e   : > { %3578 = vsyncadd (%p4623_p2), [#allocation12], 4294967024 }
 0x12f   : > { %3580 = dma.done.wait (%p4624_p3), [#allocation15], 32   ;;  %p4625_p4 = pmov %p4616_p0 }
 0x130   : > { %p4626_p7 = pmov %p4616_p0 }
 0x131   : > { %3582 = vsyncadd (%p4625_p4), [#allocation15], 4294967264 }
 0x132   : > { %3584 = dma.done.wait (%p4626_p7), [#allocation18], 16   ;;  %p4627_p8 = pmov %p4616_p0 }
 0x133   : > { %s2709_s30 = sshll.u32 %s3768_s2, 1  ;;  %vm4588_vm0 = vcmask 261120   ;;  %s4628_s6 = sld [smem:[#allocation36_spill]]  ;;  %v3623_v15 = vmov 0.0   ;;  %vm3624_vm1 = vmmov 0   ;;  %v3149_v34 = vld [vmem:[%s4556_s5] sm:$0xff]  }
 0x134   : > { %3586 = vsyncadd (%p4627_p8), [#allocation18], 4294967280  ;;  %p764_p11 = scmp.lt.s32.totalorder %s2709_s30, 3  ;;  %s4629_s18 = sld [smem:[#allocation39_spill]]  ;;  %2828 = vmatprep.subr.bf16.mxu0 %v3623_v15  ;;  %2836 = vmatprep.subr.bf16.mxu1 %v3623_v15  ;;  %v2712_v29 = vld [vmem:[#allocation2] ss:$0 sm:$0xff] }
 0x135   : > { %2832 = vmatprep.mubr.msk.bf16.mxu0 %vm3624_vm1, %v3623_v15  ;;  %2844 = vmatprep.mubr.msk.bf16.mxu1 %vm3624_vm1, %v3623_v15  ;;  %s4630_s19 = sld [smem:[#allocation37_spill]]  ;;  %v3150_v35 = vld [vmem:[%s4556_s5 + $0x8] sm:$0xff]   ;;  %v3151_v36 = vld [vmem:[%s4556_s5 + $0x10] sm:$0xff]   ;;  %v3152_v37 = vld [vmem:[%s4556_s5 + $0x18] sm:$0xff]   ;;  %vm938_vm2 = vcmask 523264   ;;  %s3625_s28 = smov 88  }
 0x136   : > { %s4650_s30 = smov (!%p764_p11, %s2709_s30), 3  ;;  %2837 = vmatpush3.bf16.msra.mxu1 %v3149_v34  ;;  %v2713_v38 = vld [vmem:[#allocation5] ss:$0 sm:$0xff]  ;;  %v2717_v56 = vld [vmem:[#allocation7] ss:$0 sm:$0xff]  ;;  %s3626_s26 = smov 96  }
 0x137   : > { %s2710_s27 = sshll.u32 %s4650_s30, 3  ;;  %2838 = vmatprep.subr.bf16.mxu1 %v3623_v15  ;;  %s3627_s0 = smov 120   ;;  %vm1103_vm3 = vcmask 64512   ;;  %vm1168_vm4 = vcmask 1043456   ;;  %vm1558_vm5 = vcmask 130048   ;;  %vm1560_vm6 = vcmask 195584  }
 0x138   : > { %s3629_s7 = smov 80   ;;  %s3630_s3 = smov 104  }
 0x139   : > { %s767_s21 = scalar_lea.vmem %s4628_s6, %s2710_s27  ;;  %s3631_s1 = smov 72  }
 0x13a   : > { %v4048_v0 = vld [vmem:[%s767_s21] sm:$0xff]  ;;  %v4050_v1 = vld [vmem:[%s767_s21 + $0x8] sm:$0xff]  ;;  %2839 = vmatpush3.bf16.msra.mxu1 %v3150_v35  ;;  %s3632_s30 = smov 56   ;;  %s3633_s27 = smov 64  }
 0x13b   : > { %v777_v2 = vsel %vm4588_vm0, %v4048_v0, 0.0  ;;  %v780_v3 = vsel %vm4588_vm0, %v4050_v1, 0.0  ;;  %v3147_v14 = vld [vmem:[%s4629_s18] sm:$0xff]   ;;  %v3148_v16 = vld [vmem:[%s4629_s18 + $0x8] sm:$0xff]   ;;  %2840 = vmatprep.subr.bf16.mxu1 %v3623_v15  ;;  %s3634_s25 = smov 48   ;;  %s3635_s24 = smov 40  }
 0x13c   : > { %778 = vadd.xlane.f32.xlu0 %v777_v2  ;;  %2829 = vmatpush3.bf16.msra.mxu0 %v3147_v14  ;;  %v2711_v25 = vld [vmem:[%s4630_s19] ss:$0 sm:$0xff]  ;;  %v2725_v35 = vld [vmem:[#allocation11] ss:$0 sm:$0xff]  ;;  %s3628_s19 = smov 112   ;;  %s3636_s6 = smov 8  }
 0x13d   : > { %2830 = vmatprep.subr.bf16.mxu0 %v3623_v15  ;;  %s3637_s21 = smov 16   ;;  %s3638_s17 = smov 24  }
 0x13e   : > { %2841 = vmatpush3.bf16.msra.mxu1 %v3151_v36  ;;  %s4300_s23 = sand.u32 1, %s3601_s22   ;;  %p4632_p0 = scmp.ne.s32.totalorder %s4605_s4, 0 }
 0x13f   : > { %2842 = vmatprep.subr.bf16.mxu1 %v3623_v15  ;;  %s2707_s29 = sshll.u32 %s4300_s23, 4 }
 0x140   : > { %781 = vadd.xlane.f32.xlu0 %v780_v3  ;;  %2831 = vmatpush3.bf16.msra.mxu0 %v3148_v16  ;;  %v3153_v16 = vld [vmem:[%s4560_s9] sm:$0xff]  }
 0x141   : > { %2848 = vmatprep.subr.bf16.mxu0 %v3623_v15 }
 0x142   : > { %2843 = vmatpush3.bf16.msra.mxu1 %v3152_v37 }
 0x143   : > { %2862 = vmatprep.subr.bf16.mxu1 %v3623_v15 }
 0x1c9   : > { %v779_v4 = vpop.xlane.xlu0 %778 }
 0x1ca   : > { %v784_v5 = vmul.f32 0.03125, %v779_v4 }
 0x1cc   : > { %v786_v6 = vsub.f32 %v4048_v0, %v784_v5 }
 0x1cd   : > { %v782_v7 = vpop.xlane.xlu0 %781 }
 0x1ce   : > { %v785_v8 = vmul.f32 0.03125, %v782_v7  ;;  %v788_v9 = vmul.f32 %v786_v6, %v786_v6 }
 0x1d0   : > { %v787_v10 = vsub.f32 %v4050_v1, %v785_v8  ;;  %v790_v11 = vsel %vm4588_vm0, %v788_v9, 0.0 }
 0x1d1   : > { %791 = vadd.xlane.f32.xlu1 %v790_v11 }
 0x1d2   : > { %v789_v12 = vmul.f32 %v787_v10, %v787_v10 }
 0x1d4   : > { %v793_v13 = vsel %vm4588_vm0, %v789_v12, 0.0 }
 0x1d5   : > { %794 = vadd.xlane.f32.xlu1 %v793_v13 }
 0x25e   : > { %v792_v17 = vpop.xlane.xlu1 %791 }
 0x25f   : > { %v796_v18 = vmul.f32 0.03125, %v792_v17  ;;  %v3154_v17 = vld [vmem:[%s4560_s9 + $0x8] sm:$0xff]  }
 0x261   : > { %v798_v19 = vadd.f32 1e-05, %v796_v18 }
 0x262   : > { %v795_v20 = vpop.xlane.xlu1 %794 }
 0x263   : > { %3159 = vrsqrt.f32 %v798_v19  ;;  %v797_v21 = vmul.f32 0.03125, %v795_v20 }
 0x265   : > { %v799_v22 = vadd.f32 1e-05, %v797_v21 }
 0x267   : > { %3161 = vrsqrt.f32 %v799_v22 }
 0x26d   : > { %v3160_v23 = vpop.eup %3159 }
 0x26e   : > { %v802_v24 = vmul.f32 %v3160_v23, %v786_v6 }
 0x270   : > { %v810_v28 = vmul.f32 %v2711_v25, %v802_v24 }
 0x271   : > { %v3162_v26 = vpop.eup %3161 }
 0x272   : > { %v803_v27 = vmul.f32 %v3162_v26, %v787_v10  ;;  %v818_v31 = vadd.f32 %v2712_v29, %v810_v28 }
 0x274   : > { %v811_v30 = vmul.f32 %v2711_v25, %v803_v27  ;;  %v2723_v25 = vld [vmem:[#allocation8] ss:$0 sm:$0xff] }
 0x276   : > { %v819_v32 = vadd.f32 %v2712_v29, %v811_v30  ;;  %v2724_v30 = vld [vmem:[#allocation10] ss:$0 sm:$0xff] }
 0x278   : > { %v820_v33 = vpack.c.bf16 %v819_v32, %v818_v31 }
 0x27a   : > { %2833 = vmatmul.mubr.msk.bf16.vlgmr.msra.gmra.mrb[0].mxu0 %vm4588_vm0, %v820_v33 }
 0x27b   : > { %2852 = vmatprep.mubr.msk.bf16.mxu0 %vm3624_vm1, %v3623_v15  ;;  %2849 = vmatpush3.bf16.msra.mxu0 %v3153_v16 }
 0x27c   : > { %2850 = vmatprep.subr.bf16.mxu0 %v3623_v15 }
 0x27f   : > { %2851 = vmatpush3.bf16.msra.mxu0 %v3154_v17 }
 0x280   : > { %2856 = vmatprep.subr.bf16.mxu0 %v3623_v15 }
 0x34d   : > { %v881_v39 = vpop.f32.mrb[0].mxu0 }
 0x34e   : > { %v882_v40 = vadd.f32 %v2713_v38, %v881_v39  ;;  %v2834_v41 = vpop.f32.mrb[1].mxu0 }
 0x34f   : > { %v884_v42 = vpop.f32.mrb[2].mxu0 }
 0x350   : > { %v888_v43 = vmul.f32 0.5, %v882_v40  ;;  %v885_v44 = vadd.f32 %v2713_v38, %v884_v42  ;;  %v2835_v45 = vpop.f32.mrb[3].mxu0 }
 0x352   : > { %3163 = vtanh.f32 %v888_v43  ;;  %v889_v46 = vmul.f32 0.5, %v885_v44 }
 0x354   : > { %3165 = vtanh.f32 %v889_v46 }
 0x35c   : > { %v3164_v47 = vpop.eup %3163 }
 0x35d   : > { %v892_v48 = vadd.f32 1.0, %v3164_v47 }
 0x35e   : > { %v3166_v49 = vpop.eup %3165 }
 0x35f   : > { %v894_v50 = vmul.f32 0.5, %v892_v48  ;;  %v893_v51 = vadd.f32 1.0, %v3166_v49 }
 0x361   : > { %v895_v52 = vmul.f32 0.5, %v893_v51  ;;  %v896_v53 = vmul.f32 %v894_v50, %v882_v40 }
 0x363   : > { %v897_v54 = vmul.f32 %v895_v52, %v885_v44 }
 0x365   : > { %v898_v55 = vpack.c.bf16 %v897_v54, %v896_v53 }
 0x367   : > { %2845 = vmatmul.mubr.msk.bf16.vlgmr.msra.gmra.mrb[0].mxu1 %vm938_vm2, %v898_v55 }
 0x368   : > { %2864 = vmatprep.mubr.msk.bf16.mxu1 %vm3624_vm1, %v3623_v15 }
 0x43a   : > { %v976_v57 = vpop.f32.mrb[0].mxu1 }
 0x43b   : > { %v977_v58 = vadd.f32 %v2717_v56, %v976_v57  ;;  %v2846_v59 = vpop.f32.mrb[1].mxu1 }
 0x43c   : > { %v979_v60 = vpop.f32.mrb[2].mxu1 }
 0x43d   : > { %v983_v61 = vmul.f32 0.5, %v977_v58  ;;  %v980_v62 = vadd.f32 %v2717_v56, %v979_v60  ;;  %v2847_v63 = vpop.f32.mrb[3].mxu1 }
 0x43f   : > { %v4099_v2 = vadd.f32 %v983_v61, %v4048_v0  ;;  %v984_v3 = vmul.f32 0.5, %v980_v62 }
 0x441   : > { %v4102_v4 = vadd.f32 %v984_v3, %v4050_v1  ;;  %v989_v5 = vsel %vm4588_vm0, %v4099_v2, 0.0 }
 0x442   : > { %990 = vadd.xlane.f32.xlu0 %v989_v5 }
 0x443   : > { %v992_v6 = vsel %vm4588_vm0, %v4102_v4, 0.0 }
 0x444   : > { %993 = vadd.xlane.f32.xlu1 %v992_v6 }
 0x4cf   : > { %v991_v7 = vpop.xlane.xlu0 %990 }
 0x4d0   : > { %v995_v8 = vmul.f32 0.03125, %v991_v7 }
 0x4d1   : > { %v994_v9 = vpop.xlane.xlu1 %993 }
 0x4d2   : > { %v997_v10 = vsub.f32 %v4099_v2, %v995_v8  ;;  %v996_v11 = vmul.f32 0.03125, %v994_v9 }
 0x4d4   : > { %v998_v0 = vsub.f32 %v4102_v4, %v996_v11  ;;  %v999_v12 = vmul.f32 %v997_v10, %v997_v10 }
 0x4d6   : > { %v1001_v1 = vsel %vm4588_vm0, %v999_v12, 0.0  ;;  %v1000_v13 = vmul.f32 %v998_v0, %v998_v0 }
 0x4d7   : > { %1002 = vadd.xlane.f32.xlu0 %v1001_v1 }
 0x4d8   : > { %v1004_v14 = vsel %vm4588_vm0, %v1000_v13, 0.0 }
 0x4d9   : > { %1005 = vadd.xlane.f32.xlu1 %v1004_v14 }
 0x564   : > { %v1003_v18 = vpop.xlane.xlu0 %1002 }
 0x565   : > { %v1007_v19 = vmul.f32 0.03125, %v1003_v18 }
 0x566   : > { %v1006_v20 = vpop.xlane.xlu1 %1005 }
 0x567   : > { %v1009_v21 = vadd.f32 1e-05, %v1007_v19  ;;  %v1008_v22 = vmul.f32 0.03125, %v1006_v20 }
 0x569   : > { %3167 = vrsqrt.f32 %v1009_v21  ;;  %v1010_v23 = vadd.f32 1e-05, %v1008_v22 }
 0x56b   : > { %3169 = vrsqrt.f32 %v1010_v23 }
 0x573   : > { %v3168_v24 = vpop.eup %3167 }
 0x574   : > { %v1013_v26 = vmul.f32 %v3168_v24, %v997_v10 }
 0x575   : > { %v3170_v27 = vpop.eup %3169 }
 0x576   : > { %v1021_v28 = vmul.f32 %v2723_v25, %v1013_v26  ;;  %v1014_v29 = vmul.f32 %v3170_v27, %v998_v0 }
 0x578   : > { %v1022_v31 = vmul.f32 %v2723_v25, %v1014_v29  ;;  %v1029_v32 = vadd.f32 %v2724_v30, %v1021_v28 }
 0x57a   : > { %v1030_v33 = vadd.f32 %v2724_v30, %v1022_v31 }
 0x57c   : > { %v1031_v34 = vpack.c.bf16 %v1030_v33, %v1029_v32 }
 0x57e   : > { %2853 = vmatmul.mubr.msk.bf16.vlgmr.msra.gmra.mrb[4].mxu0 %vm4588_vm0, %v1031_v34 }
 0x57f   : > { %2858 = vmatprep.mubr.msk.bf16.mxu0 %vm3624_vm1, %v3623_v15 }
 0x651   : > { %v1092_v36 = vpop.f32.mrb[4].mxu0 }
 0x652   : > { %v1093_v37 = vadd.f32 %v2725_v35, %v1092_v36  ;;  %v2854_v38 = vpop.f32.mrb[5].mxu0 }
 0x653   : > { %v1095_v39 = vpop.f32.mrb[6].mxu0 }
 0x654   : > { %v4123_v40 = vpack.c.bf16 %v1093_v37, %v1093_v37  ;;  %v2855_v41 = vpop.f32.mrb[7].mxu0  ;;  %v1096_v42 = vadd.f32 %v2725_v35, %v1095_v39 }
 0x656   : > { %1214 = vrot.lane.b32.xlu1 %v4123_v40, %s3625_s28  ;;  %1101 = vrot.lane.b32.xlu0 %v4123_v40, %s3626_s26  ;;  %v4132_v43 = vpack.c.bf16 %v1096_v42, %v1096_v42 }
 0x65a   : > { %1212 = vrot.lane.b32.xlu1 %v4123_v40, %s3627_s0  ;;  %1323 = vrot.lane.b32.xlu0 %v4123_v40, %s3628_s19 }
 0x65e   : > { %1325 = vrot.lane.b32.xlu1 %v4123_v40, %s3629_s7  ;;  %1434 = vrot.lane.b32.xlu0 %v4123_v40, %s3630_s3 }
 0x662   : > { %1436 = vrot.lane.b32.xlu1 %v4123_v40, %s3631_s1  ;;  %1675 = vrot.lane.b32.xlu0 %v4132_v43, %s3625_s28  ;;  %s4306_s28 = scalar_lea.vmem [#allocation19], %s2707_s29 }
 0x666   : > { %1786 = vrot.lane.b32.xlu0 %v4132_v43, %s3629_s7  ;;  %1564 = vrot.lane.b32.xlu1 %v4132_v43, %s3626_s26 }
 0x66a   : > { %1897 = vrot.lane.b32.xlu0 %v4132_v43, %s3631_s1  ;;  %1673 = vrot.lane.b32.xlu1 %v4132_v43, %s3627_s0  ;;  %s2475_s0 = sshll.u32 %s4306_s28, 4  ;;  %s4345_s0 = int_to_ptr.vmem [resolvable:$true] %s2475_s0 }
 0x66b   : > { %s3491_s7 = scalar_lea.vmem %s4345_s0, 256 }
 0x66c   : > { %p3492_p13 = scmp.ne.s32.totalorder %s4345_s0, %s3491_s7 }
 0x66e   : > { %1784 = vrot.lane.b32.xlu1 %v4132_v43, %s3628_s19  ;;  %s2457_s19 = scalar_lea.sflag [#allocation4], %s4300_s23  ;;  %p3493_p1 = pnand %p3492_p13, %p4632_p0 }
 0x670   : > { %p3494_p6 = pneg %p3493_p1 }
 0x672   : > { %1895 = vrot.lane.b32.xlu1 %v4132_v43, %s3630_s3 }
 0x676   : > { %1275 = vrot.lane.b32.xlu1 %v4123_v40, %s3632_s30 }
 0x6c8   : > { %v1102_v44 = vpop.permute.xlu0 %1101  ;;  %v1215_v46 = vpop.permute.xlu1 %1214 }
 0x6c9   : > { %v1108_v45 = vsel %vm1103_vm3, %v1102_v44, 0  ;;  %v1220_v48 = vsel %vm1103_vm3, %v1215_v46, 0 }
 0x6ca   : > { %2857 = vmatpush3.bf16.xpose.msra.mxu0 %v1108_v45 }
 0x6cb   : > { %2868 = vmatprep.subr.bf16.mxu0 %v3623_v15 }
 0x6cc   : > { %v1213_v47 = vpop.permute.xlu1 %1212  ;;  %v1324_v52 = vpop.permute.xlu0 %1323 }
 0x6d0   : > { %v1326_v49 = vpop.permute.xlu1 %1325  ;;  %v1435_v55 = vpop.permute.xlu0 %1434 }
 0x6d1   : > { %2859 = vmatmul.mubr.msk.bf16.vlgmr.msra.gmra.mrb[8].mxu0 %vm1103_vm3, %v4123_v40  ;;  %v1331_v50 = vsel %vm1103_vm3, %v1326_v49, 0 }
 0x6d2   : > { %2869 = vmatpush3.bf16.xpose.msra.mxu0 %v1220_v48  ;;  %2870 = vmatprep.mubr.msk.bf16.mxu0 %vm3624_vm1, %v3623_v15 }
 0x6d3   : > { %2880 = vmatprep.subr.bf16.mxu0 %v3623_v15 }
 0x6d4   : > { %v1437_v51 = vpop.permute.xlu1 %1436  ;;  %v1676_v57 = vpop.permute.xlu0 %1675 }
 0x6d5   : > { %v1442_v53 = vsel %vm1103_vm3, %v1437_v51, 0  ;;  %v1681_v58 = vsel %vm1103_vm3, %v1676_v57, 0 }
 0x6d8   : > { %v1565_v54 = vpop.permute.xlu1 %1564  ;;  %v1787_v59 = vpop.permute.xlu0 %1786 }
 0x6d9   : > { %2871 = vmatmul.mubr.msk.bf16.vlgmr.msra.gmra.mrb[12].mxu0 %vm1103_vm3, %v1213_v47  ;;  %v1570_v56 = vsel %vm1103_vm3, %v1565_v54, 0  ;;  %v1792_v61 = vsel %vm1103_vm3, %v1787_v59, 0 }
 0x6da   : > { %2881 = vmatpush3.bf16.xpose.msra.mxu0 %v1331_v50  ;;  %2882 = vmatprep.mubr.msk.bf16.mxu0 %vm3624_vm1, %v3623_v15 }
 0x6db   : > { %2892 = vmatprep.subr.bf16.mxu0 %v3623_v15 }
 0x6dc   : > { %v1674_v60 = vpop.permute.xlu1 %1673  ;;  %v1898_v62 = vpop.permute.xlu0 %1897 }
 0x6dd   : > { %v1903_v3 = vsel %vm1103_vm3, %v1898_v62, 0 }
 0x6e0   : > { %v1785_v63 = vpop.permute.xlu1 %1784 }
 0x6e1   : > { %2883 = vmatmul.mubr.msk.bf16.vlgmr.msra.gmra.mrb[16].mxu0 %vm1103_vm3, %v1324_v52 }
 0x6e2   : > { %2893 = vmatpush3.bf16.xpose.msra.mxu0 %v1442_v53  ;;  %2894 = vmatprep.mubr.msk.bf16.mxu0 %vm3624_vm1, %v3623_v15 }
 0x6e3   : > { %2904 = vmatprep.subr.bf16.mxu0 %v3623_v15 }
 0x6e4   : > { %v1896_v5 = vpop.permute.xlu1 %1895 }
 0x6e9   : > { %2895 = vmatmul.mubr.msk.bf16.vlgmr.msra.gmra.mrb[20].mxu0 %vm1103_vm3, %v1435_v55 }
 0x6ea   : > { %2905 = vmatpush3.bf16.xpose.msra.mxu0 %v1570_v56  ;;  %2906 = vmatprep.mubr.msk.bf16.mxu0 %vm3624_vm1, %v3623_v15 }
 0x6eb   : > { %2916 = vmatprep.subr.bf16.mxu0 %v3623_v15 }
 0x6f1   : > { %2907 = vmatmul.mubr.msk.bf16.vlgmr.msra.gmra.mrb[24].mxu0 %vm1103_vm3, %v4132_v43 }
 0x6f2   : > { %2917 = vmatpush3.bf16.xpose.msra.mxu0 %v1681_v58  ;;  %2918 = vmatprep.mubr.msk.bf16.mxu0 %vm3624_vm1, %v3623_v15  ;;  %v4208_v58 = vpop.permute.xlu1 %1275 }
 0x6f3   : > { %2928 = vmatprep.subr.bf16.mxu0 %v3623_v15 }
 0x6f9   : > { %2919 = vmatmul.mubr.msk.bf16.vlgmr.msra.gmra.mrb[28].mxu0 %vm1103_vm3, %v1674_v60 }
 0x6fa   : > { %2929 = vmatpush3.bf16.xpose.msra.mxu0 %v1792_v61  ;;  %2930 = vmatprep.mubr.msk.bf16.mxu0 %vm3624_vm1, %v3623_v15 }
 0x6fb   : > { %2940 = vmatprep.subr.bf16.mxu0 %v3623_v15 }
 0x701   : > { %2931 = vmatmul.mubr.msk.bf16.vlgmr.msra.gmra.mrb[32].mxu0 %vm1103_vm3, %v1785_v63 }
 0x702   : > { %2941 = vmatpush3.bf16.xpose.msra.mxu0 %v1903_v3  ;;  %2942 = vmatprep.mubr.msk.bf16.mxu0 %vm3624_vm1, %v3623_v15 }
 0x703   : > { %2952 = vmatprep.subr.bf16.mxu0 %v3623_v15 }
 0x709   : > { %2943 = vmatmul.mubr.msk.bf16.vlgmr.msra.gmra.mrb[36].mxu0 %vm1103_vm3, %v1896_v5 }
 0x70a   : > { %2956 = vmatprep.mubr.msk.bf16.mxu0 %vm3624_vm1, %v3623_v15 }
 0x7a4   : > { %v1144_v6 = vpop.f32.mrb[8].mxu0 }
 0x7a5   : > { %v1150_v7 = vmul.f32 0.35355338, %v1144_v6  ;;  %v2860_v8 = vpop.f32.mrb[9].mxu0 }
 0x7a6   : > { %v1147_v9 = vpop.f32.mrb[10].mxu0 }
 0x7a7   : > { %v2861_v10 = vpop.f32.mrb[11].mxu0  ;;  %v1151_v11 = vsel %vm1103_vm3, %v1150_v7, -inf }
 0x7a8   : > { %1152 = vmax.xlane.f32.xlu0 %v1151_v11 }
 0x7ac   : > { %v1256_v0 = vpop.f32.mrb[12].mxu0 }
 0x7ad   : > { %v4188_v12 = vmul.f32 0.35355338, %v1256_v0  ;;  %v2872_v1 = vpop.f32.mrb[13].mxu0 }
 0x7ae   : > { %v1259_v13 = vpop.f32.mrb[14].mxu0 }
 0x7af   : > { %v2873_v14 = vpop.f32.mrb[15].mxu0  ;;  %v1263_v16 = vsel %vm1103_vm3, %v4188_v12, -inf }
 0x7b0   : > { %1264 = vmax.xlane.f32.xlu1 %v1263_v16 }
 0x7b4   : > { %v1367_v17 = vpop.f32.mrb[16].mxu0 }
 0x7b5   : > { %v2884_v18 = vpop.f32.mrb[17].mxu0  ;;  %v1373_v39 = vmul.f32 0.35355338, %v1367_v17 }
 0x7b6   : > { %v1370_v19 = vpop.f32.mrb[18].mxu0 }
 0x7b7   : > { %v2885_v20 = vpop.f32.mrb[19].mxu0  ;;  %v1374_v44 = vsel %vm1103_vm3, %v1373_v39, -inf }
 0x7bc   : > { %v1478_v21 = vpop.f32.mrb[20].mxu0 }
 0x7bd   : > { %v2896_v22 = vpop.f32.mrb[21].mxu0  ;;  %v1484_v41 = vmul.f32 0.35355338, %v1478_v21 }
 0x7be   : > { %1163 = vrot.lane.b32.xlu0 %v4123_v40, %s3633_s27  ;;  %v1481_v23 = vpop.f32.mrb[22].mxu0 }
 0x7bf   : > { %v2897_v24 = vpop.f32.mrb[23].mxu0  ;;  %v1485_v51 = vsel %vm1103_vm3, %v1484_v41, -inf }
 0x7c4   : > { %v1606_v25 = vpop.f32.mrb[24].mxu0 }
 0x7c5   : > { %v2908_v26 = vpop.f32.mrb[25].mxu0  ;;  %v1612_v50 = vmul.f32 0.35355338, %v1606_v25 }
 0x7c6   : > { %v1609_v27 = vpop.f32.mrb[26].mxu0 }
 0x7c7   : > { %v2909_v28 = vpop.f32.mrb[27].mxu0  ;;  %v1613_v53 = vsel %vm1103_vm3, %v1612_v50, -inf }
 0x7cc   : > { %v1717_v29 = vpop.f32.mrb[28].mxu0 }
 0x7cd   : > { %v4194_v30 = vmul.f32 0.35355338, %v1717_v29  ;;  %v2920_v31 = vpop.f32.mrb[29].mxu0 }
 0x7ce   : > { %v1720_v32 = vpop.f32.mrb[30].mxu0 }
 0x7cf   : > { %v2921_v33 = vpop.f32.mrb[31].mxu0  ;;  %v1724_v34 = vsel %vm1103_vm3, %v4194_v30, -inf }
 0x7d0   : > { %1725 = vmax.xlane.f32.xlu1 %v1724_v34 }
 0x7d4   : > { %v1828_v35 = vpop.f32.mrb[32].mxu0 }
 0x7d5   : > { %v2932_v36 = vpop.f32.mrb[33].mxu0  ;;  %v1834_v52 = vmul.f32 0.35355338, %v1828_v35 }
 0x7d6   : > { %v1831_v37 = vpop.f32.mrb[34].mxu0 }
 0x7d7   : > { %v2933_v38 = vpop.f32.mrb[35].mxu0  ;;  %v1835_v54 = vsel %vm1103_vm3, %v1834_v52, -inf }
 0x7dc   : > { %v1939_v42 = vpop.f32.mrb[36].mxu0 }
 0x7dd   : > { %v4199_v45 = vmul.f32 0.35355338, %v1939_v42  ;;  %1375 = vmax.xlane.f32.xlu0 %v1374_v44  ;;  %v2944_v46 = vpop.f32.mrb[37].mxu0  ;;  %v1281_v44 = vsel %vm1168_vm4, %v4208_v58, 0 }
 0x7de   : > { %v1942_v47 = vpop.f32.mrb[38].mxu0 }
 0x7df   : > { %v2945_v48 = vpop.f32.mrb[39].mxu0  ;;  %v1946_v49 = vsel %vm1103_vm3, %v4199_v45, -inf }
 0x7e0   : > { %1947 = vmax.xlane.f32.xlu1 %v1946_v49 }
 0x7e1   : > { %1486 = vmax.xlane.f32.xlu0 %v1485_v51 }
 0x7e5   : > { %1614 = vmax.xlane.f32.xlu0 %v1613_v53 }
 0x7e9   : > { %1836 = vmax.xlane.f32.xlu0 %v1835_v54 }
 0x7ff   : > { %1386 = vrot.lane.b32.xlu0 %v4123_v40, %s3634_s25 }
 0x835   : > { %v1153_v55 = vpop.xlane.xlu0 %1152 }
 0x836   : > { %v1154_v56 = vsub.f32 %v1150_v7, %v1153_v55 }
 0x838   : > { %v1155_v57 = vmul.f32 1.442695, %v1154_v56 }
 0x839   : > { %v1164_v59 = vpop.permute.xlu0 %1163 }
 0x83a   : > { %3171 = vpow2.f32 %v1155_v57  ;;  %v1170_v60 = vsel %vm1168_vm4, %v1164_v59, 0 }
 0x83b   : > { %2863 = vmatpush3.bf16.msra.mxu1 %v1170_v60 }
 0x83c   : > { %2874 = vmatprep.subr.bf16.mxu1 %v3623_v15 }
 0x83d   : > { %v1265_v61 = vpop.xlane.xlu1 %1264 }
 0x83e   : > { %v1266_v62 = vsub.f32 %v4188_v12, %v1265_v61 }
 0x840   : > { %v1267_v63 = vmul.f32 1.442695, %v1266_v62 }
 0x842   : > { %3173 = vpow2.f32 %v1267_v63 }
 0x844   : > { %v3172_v3 = vpop.eup %3171 }
 0x845   : > { %v1157_v5 = vsel %vm1103_vm3, %v3172_v3, 0.0 }
 0x846   : > { %1158 = vadd.xlane.f32.xlu0 %v1157_v5 }
 0x84c   : > { %v4214_v6 = vpop.eup %3173 }
 0x84d   : > { %v1269_v7 = vsel %vm1103_vm3, %v4214_v6, 0.0 }
 0x84e   : > { %1270 = vadd.xlane.f32.xlu1 %v1269_v7 }
 0x85d   : > { %v1726_v1 = vpop.xlane.xlu1 %1725 }
 0x85e   : > { %v1727_v16 = vsub.f32 %v4194_v30, %v1726_v1 }
 0x85f   : > { %1625 = vrot.lane.b32.xlu1 %v4132_v43, %s3633_s27  ;;  %s2777_s27 = sshll.u32 %s3768_s2, 8 }
 0x860   : > { %v1728_v19 = vmul.f32 1.442695, %v1727_v16 }
 0x86a   : > { %v1376_v8 = vpop.xlane.xlu0 %1375 }
 0x86b   : > { %v1377_v9 = vsub.f32 %v1373_v39, %v1376_v8 }
 0x86d   : > { %v1378_v10 = vmul.f32 1.442695, %v1377_v9  ;;  %v1948_v30 = vpop.xlane.xlu1 %1947 }
 0x86e   : > { %v1487_v11 = vpop.xlane.xlu0 %1486  ;;  %v1949_v31 = vsub.f32 %v4199_v45, %v1948_v30 }
 0x86f   : > { %3175 = vpow2.f32 %v1378_v10  ;;  %v1488_v0 = vsub.f32 %v1484_v41, %v1487_v11 }
 0x870   : > { %v1950_v33 = vmul.f32 1.442695, %v1949_v31 }
 0x871   : > { %v1489_v12 = vmul.f32 1.442695, %v1488_v0 }
 0x872   : > { %v1615_v13 = vpop.xlane.xlu0 %1614 }
 0x873   : > { %v1616_v14 = vsub.f32 %v1612_v50, %v1615_v13  ;;  %3177 = vpow2.f32 %v1489_v12 }
 0x875   : > { %v1617_v17 = vmul.f32 1.442695, %v1616_v14 }
 0x876   : > { %v1837_v27 = vpop.xlane.xlu0 %1836 }
 0x877   : > { %3179 = vpow2.f32 %v1617_v17  ;;  %v1838_v28 = vsub.f32 %v1834_v52, %v1837_v27 }
 0x878   : > { %3181 = vpow2.f32 %v1728_v19 }
 0x879   : > { %v3176_v18 = vpop.eup %3175  ;;  %v1839_v29 = vmul.f32 1.442695, %v1838_v28 }
 0x87a   : > { %v1380_v20 = vsel %vm1103_vm3, %v3176_v18, 0.0  ;;  %v1387_v36 = vpop.permute.xlu0 %1386 }
 0x87b   : > { %1381 = vadd.xlane.f32.xlu0 %v1380_v20  ;;  %3183 = vpow2.f32 %v1839_v29  ;;  %v1392_v47 = vsel %vm1168_vm4, %v1387_v36, 0 }
 0x87c   : > { %3185 = vpow2.f32 %v1950_v33 }
 0x87d   : > { %v4222_v21 = vpop.eup %3177 }
 0x87e   : > { %v1491_v22 = vsel %vm1103_vm3, %v4222_v21, 0.0 }
 0x881   : > { %v4226_v23 = vpop.eup %3179 }
 0x882   : > { %v1619_v24 = vsel %vm1103_vm3, %v4226_v23, 0.0  ;;  %v4230_v25 = vpop.eup %3181 }
 0x883   : > { %1492 = vadd.xlane.f32.xlu1 %v1491_v22  ;;  %v1730_v26 = vsel %vm1103_vm3, %v4230_v25, 0.0 }
 0x885   : > { %v4238_v32 = vpop.eup %3183 }
 0x886   : > { %v1841_v34 = vsel %vm1103_vm3, %v4238_v32, 0.0  ;;  %v4242_v35 = vpop.eup %3185 }
 0x887   : > { %1620 = vadd.xlane.f32.xlu1 %v1619_v24 }
 0x88b   : > { %1731 = vadd.xlane.f32.xlu1 %v1730_v26 }
 0x891   : > { %1497 = vrot.lane.b32.xlu0 %v4123_v40, %s3635_s24  ;;  %v1952_v40 = vsel %vm1103_vm3, %v4242_v35, 0.0 }
 0x89c   : > { %1736 = vrot.lane.b32.xlu1 %v4132_v43, %s3632_s30 }
 0x8b0   : > { %1842 = vadd.xlane.f32.xlu0 %v1841_v34 }
 0x8c0   : > { %1953 = vadd.xlane.f32.xlu1 %v1952_v40 }
 0x8c6   : > { %1847 = vrot.lane.b32.xlu0 %v4132_v43, %s3634_s25 }
 0x8d1   : > { %1958 = vrot.lane.b32.xlu1 %v4132_v43, %s3635_s24 }
 0x8d3   : > { %v1159_v37 = vpop.xlane.xlu0 %1158 }
 0x8d4   : > { %3187 = vrcp.f32 %v1159_v37 }
 0x8db   : > { %v1271_v38 = vpop.xlane.xlu1 %1270 }
 0x8dc   : > { %3189 = vrcp.f32 %v1271_v38 }
 0x8de   : > { %v3188_v39 = vpop.eup %3187 }
 0x8df   : > { %v1161_v41 = vmul.f32 %v3188_v39, %v3172_v3  ;;  %v1626_v49 = vpop.permute.xlu1 %1625 }
 0x8e0   : > { %v1631_v62 = vsel %vm1168_vm4, %v1626_v49, 0 }
 0x8e1   : > { %v1162_v42 = vpack.c.bf16 %v1161_v41, %v1161_v41 }
 0x8e3   : > { %2865 = vmatmul.mubr.msk.bf16.vlgmr.msra.gmra.mrb[4].mxu1 %vm1103_vm3, %v1162_v42 }
 0x8e4   : > { %2875 = vmatpush3.bf16.msra.mxu1 %v1281_v44  ;;  %2876 = vmatprep.mubr.msk.bf16.mxu1 %vm3624_vm1, %v3623_v15 }
 0x8e5   : > { %2886 = vmatprep.subr.bf16.mxu1 %v3623_v15 }
 0x8e6   : > { %v3190_v45 = vpop.eup %3189 }
 0x8e7   : > { %v1273_v43 = vmul.f32 %v3190_v45, %v4214_v6 }
 0x8e9   : > { %v1274_v46 = vpack.c.bf16 %v1273_v43, %v1273_v43 }
 0x8eb   : > { %2877 = vmatmul.mubr.msk.bf16.vlgmr.msra.gmra.mrb[8].mxu1 %vm1103_vm3, %v1274_v46  ;;  %v3155_v46 = vld [vmem:[#allocation13] sm:$0xff]  }
 0x8ec   : > { %2887 = vmatpush3.bf16.msra.mxu1 %v1392_v47  ;;  %2888 = vmatprep.mubr.msk.bf16.mxu1 %vm3624_vm1, %v3623_v15 }
 0x8ed   : > { %2898 = vmatprep.subr.bf16.mxu1 %v3623_v15  ;;  %2953 = vmatpush3.bf16.msra.mxu0 %v3155_v46  ;;  %v2750_v46 = vld [vmem:[#allocation17] ss:$0 sm:$0xff] }
 0x8ee   : > { %2954 = vmatprep.subr.bf16.mxu0 %v3623_v15 }
 0x908   : > { %v1382_v48 = vpop.xlane.xlu0 %1381 }
 0x909   : > { %3191 = vrcp.f32 %v1382_v48 }
 0x90c   : > { %v1498_v54 = vpop.permute.xlu0 %1497 }
 0x90d   : > { %v1503_v56 = vsel %vm1168_vm4, %v1498_v54, 0 }
 0x910   : > { %v1493_v50 = vpop.xlane.xlu1 %1492 }
 0x911   : > { %3193 = vrcp.f32 %v1493_v50 }
 0x913   : > { %v3192_v51 = vpop.eup %3191 }
 0x914   : > { %v1384_v52 = vmul.f32 %v3192_v51, %v3176_v18  ;;  %v1621_v53 = vpop.xlane.xlu1 %1620 }
 0x915   : > { %3195 = vrcp.f32 %v1621_v53 }
 0x916   : > { %v1385_v55 = vpack.c.bf16 %v1384_v52, %v1384_v52  ;;  %v3156_v52 = vld [vmem:[#allocation13 + $0x8] sm:$0xff]  }
 0x917   : > { %2955 = vmatpush3.bf16.msra.mxu0 %v3156_v52 }
 0x918   : > { %2889 = vmatmul.mubr.msk.bf16.vlgmr.msra.gmra.mrb[12].mxu1 %vm1103_vm3, %v1385_v55  ;;  %v1732_v57 = vpop.xlane.xlu1 %1731 }
 0x919   : > { %2899 = vmatpush3.bf16.msra.mxu1 %v1503_v56  ;;  %2900 = vmatprep.mubr.msk.bf16.mxu1 %vm3624_vm1, %v3623_v15  ;;  %3197 = vrcp.f32 %v1732_v57 }
 0x91a   : > { %2910 = vmatprep.subr.bf16.mxu1 %v3623_v15 }
 0x91b   : > { %v3194_v58 = vpop.eup %3193 }
 0x91c   : > { %v1495_v59 = vmul.f32 %v3194_v58, %v4222_v21  ;;  %v1737_v3 = vpop.permute.xlu1 %1736 }
 0x91d   : > { %v1742_v7 = vsel %vm1168_vm4, %v1737_v3, 0 }
 0x91e   : > { %v1496_v60 = vpack.c.bf16 %v1495_v59, %v1495_v59 }
 0x91f   : > { %v3196_v61 = vpop.eup %3195 }
 0x920   : > { %2901 = vmatmul.mubr.msk.bf16.vlgmr.msra.gmra.mrb[16].mxu1 %vm1103_vm3, %v1496_v60  ;;  %v1623_v63 = vmul.f32 %v3196_v61, %v4226_v23 }
 0x921   : > { %2911 = vmatpush3.bf16.msra.mxu1 %v1631_v62  ;;  %2912 = vmatprep.mubr.msk.bf16.mxu1 %vm3624_vm1, %v3623_v15 }
 0x922   : > { %2922 = vmatprep.subr.bf16.mxu1 %v3623_v15  ;;  %v1624_v5 = vpack.c.bf16 %v1623_v63, %v1623_v63 }
 0x923   : > { %v3198_v6 = vpop.eup %3197 }
 0x924   : > { %v1734_v8 = vmul.f32 %v3198_v6, %v4230_v25 }
 0x926   : > { %v1735_v9 = vpack.c.bf16 %v1734_v8, %v1734_v8 }
 0x928   : > { %2913 = vmatmul.mubr.msk.bf16.vlgmr.msra.gmra.mrb[20].mxu1 %vm1103_vm3, %v1624_v5 }
 0x929   : > { %2923 = vmatpush3.bf16.msra.mxu1 %v1742_v7  ;;  %2924 = vmatprep.mubr.msk.bf16.mxu1 %vm3624_vm1, %v3623_v15 }
 0x92a   : > { %2934 = vmatprep.subr.bf16.mxu1 %v3623_v15 }
 0x930   : > { %2925 = vmatmul.mubr.msk.bf16.vlgmr.msra.gmra.mrb[24].mxu1 %vm1103_vm3, %v1735_v9 }
 0x931   : > { %2936 = vmatprep.mubr.msk.bf16.mxu1 %vm3624_vm1, %v3623_v15 }
 0x93d   : > { %v1843_v10 = vpop.xlane.xlu0 %1842 }
 0x93e   : > { %3199 = vrcp.f32 %v1843_v10 }
 0x941   : > { %v1848_v11 = vpop.permute.xlu0 %1847 }
 0x942   : > { %v1853_v0 = vsel %vm1168_vm4, %v1848_v11, 0 }
 0x943   : > { %2935 = vmatpush3.bf16.msra.mxu1 %v1853_v0 }
 0x944   : > { %2946 = vmatprep.subr.bf16.mxu1 %v3623_v15 }
 0x948   : > { %v3200_v12 = vpop.eup %3199 }
 0x949   : > { %v1845_v1 = vmul.f32 %v3200_v12, %v4238_v32 }
 0x94b   : > { %v1846_v13 = vpack.c.bf16 %v1845_v1, %v1845_v1  ;;  %v2745_v1 = vld [vmem:[#allocation14] ss:$0 sm:$0xff] }
 0x94d   : > { %2937 = vmatmul.mubr.msk.bf16.vlgmr.msra.gmra.mrb[28].mxu1 %vm1103_vm3, %v1846_v13  ;;  %v1954_v14 = vpop.xlane.xlu1 %1953 }
 0x94e   : > { %3201 = vrcp.f32 %v1954_v14  ;;  %2948 = vmatprep.mubr.msk.bf16.mxu1 %vm3624_vm1, %v3623_v15 }
 0x951   : > { %v1959_v16 = vpop.permute.xlu1 %1958 }
 0x952   : > { %v1964_v17 = vsel %vm1168_vm4, %v1959_v16, 0 }
 0x953   : > { %2947 = vmatpush3.bf16.msra.mxu1 %v1964_v17 }
 0x954   : > { %2960 = vmatprep.subr.bf16.mxu1 %v3623_v15 }
 0x958   : > { %v3202_v18 = vpop.eup %3201 }
 0x959   : > { %v1956_v19 = vmul.f32 %v3202_v18, %v4242_v35 }
 0x95b   : > { %v1957_v20 = vpack.c.bf16 %v1956_v19, %v1956_v19 }
 0x95d   : > { %2949 = vmatmul.mubr.msk.bf16.vlgmr.msra.gmra.mrb[32].mxu1 %vm1103_vm3, %v1957_v20 }
 0x95e   : > { %2964 = vmatprep.mubr.msk.bf16.mxu1 %vm3624_vm1, %v3623_v15 }
 0x9b6   : > { %v1206_v21 = vpop.f32.mrb[4].mxu1 }
 0x9b7   : > { %v2866_v22 = vpop.f32.mrb[5].mxu1 }
 0x9b8   : > { %v1209_v23 = vpop.f32.mrb[6].mxu1 }
 0x9b9   : > { %v2867_v24 = vpop.f32.mrb[7].mxu1 }
 0x9be   : > { %v1317_v25 = vpop.f32.mrb[8].mxu1 }
 0x9bf   : > { %v2878_v26 = vpop.f32.mrb[9].mxu1 }
 0x9c0   : > { %v1320_v27 = vpop.f32.mrb[10].mxu1 }
 0x9c1   : > { %v2879_v28 = vpop.f32.mrb[11].mxu1 }
 0x9eb   : > { %v1428_v29 = vpop.f32.mrb[12].mxu1 }
 0x9ec   : > { %v2890_v30 = vpop.f32.mrb[13].mxu1 }
 0x9ed   : > { %v1431_v31 = vpop.f32.mrb[14].mxu1 }
 0x9ee   : > { %v2891_v32 = vpop.f32.mrb[15].mxu1 }
 0x9ef   : > { %v3157_v32 = vld [vmem:[%s4566_s15] sm:$0xff]  }
 0x9f0   : > { %2961 = vmatpush3.bf16.msra.mxu1 %v3157_v32 }
 0x9f1   : > { %2962 = vmatprep.subr.bf16.mxu1 %v3623_v15 }
 0x9f3   : > { %v1539_v33 = vpop.f32.mrb[16].mxu1 }
 0x9f4   : > { %v2902_v34 = vpop.f32.mrb[17].mxu1 }
 0x9f5   : > { %v1542_v35 = vpop.f32.mrb[18].mxu1 }
 0x9f6   : > { %v2903_v40 = vpop.f32.mrb[19].mxu1 }
 0x9fb   : > { %v1667_v36 = vpop.f32.mrb[20].mxu1 }
 0x9fc   : > { %v2914_v37 = vpop.f32.mrb[21].mxu1 }
 0x9fd   : > { %v1670_v38 = vpop.f32.mrb[22].mxu1 }
 0x9fe   : > { %v2915_v39 = vpop.f32.mrb[23].mxu1 }
 0xa03   : > { %v1778_v41 = vpop.f32.mrb[24].mxu1 }
 0xa04   : > { %v3132_v42 = vpack.i.bf16 %v1778_v41, %v1317_v25  ;;  %v2926_v44 = vpop.f32.mrb[25].mxu1 }
 0xa05   : > { %v1781_v45 = vpop.f32.mrb[26].mxu1 }
 0xa06   : > { %3133 = vrot.lane.b32.xlu0 %v3132_v42, %s3636_s6  ;;  %v2927_v43 = vpop.f32.mrb[27].mxu1  ;;  %v2749_v42 = vld [vmem:[#allocation16] ss:$0 sm:$0xff] }
 0xa20   : > { %v1889_v47 = vpop.f32.mrb[28].mxu1 }
 0xa21   : > { %v3137_v48 = vpack.i.bf16 %v1889_v47, %v1428_v29  ;;  %v2938_v49 = vpop.f32.mrb[29].mxu1 }
 0xa22   : > { %v1892_v50 = vpop.f32.mrb[30].mxu1 }
 0xa23   : > { %3138 = vrot.lane.b32.xlu1 %v3137_v48, %s3637_s21  ;;  %v2939_v51 = vpop.f32.mrb[31].mxu1  ;;  %v2751_v50 = vld [vmem:[%s4567_s16] ss:$0 sm:$0xff]  ;;  %s4631_s21 = sld [smem:[#allocation45_spill]] }
 0xa30   : > { %v2000_v53 = vpop.f32.mrb[32].mxu1 }
 0xa31   : > { %v3142_v54 = vpack.i.bf16 %v2000_v53, %v1539_v33  ;;  %v2950_v55 = vpop.f32.mrb[33].mxu1  ;;  %v3158_v33 = vld [vmem:[%s4566_s15 + $0x8] sm:$0xff]  }
 0xa32   : > { %v2003_v56 = vpop.f32.mrb[34].mxu1  ;;  %2963 = vmatpush3.bf16.msra.mxu1 %v3158_v33 }
 0xa33   : > { %3143 = vrot.lane.b32.xlu0 %v3142_v54, %s3638_s17  ;;  %v2951_v57 = vpop.f32.mrb[35].mxu1  ;;  %s4342_s17 = scalar_lea.hbm %s4631_s21, %s2777_s27 }
 0xa78   : > { %v3134_v58 = vpop.permute.xlu0 %3133 }
 0xa79   : > { %v3136_v60 = vunpack.i.h.bf16 %v3134_v58  ;;  %v3135_v61 = vunpack.i.l.bf16 %v3134_v58 }
 0xa7b   : > { %v2018_v5 = vsel %vm1103_vm3, %v1667_v36, %v3136_v60  ;;  %v1557_v6 = vsel %vm1103_vm3, %v1206_v21, %v3135_v61 }
 0xa95   : > { %v3139_v59 = vpop.permute.xlu1 %3138 }
 0xa96   : > { %v3141_v62 = vunpack.i.h.bf16 %v3139_v59  ;;  %v3140_v63 = vunpack.i.l.bf16 %v3139_v59 }
 0xa98   : > { %v2019_v9 = vsel %vm1558_vm5, %v2018_v5, %v3141_v62  ;;  %v1559_v10 = vsel %vm1558_vm5, %v1557_v6, %v3140_v63 }
 0xaa5   : > { %v3144_v3 = vpop.permute.xlu0 %3143 }
 0xaa6   : > { %v3146_v7 = vunpack.i.h.bf16 %v3144_v3  ;;  %v3145_v8 = vunpack.i.l.bf16 %v3144_v3 }
 0xaa8   : > { %v1561_v11 = vsel %vm1560_vm6, %v1559_v10, %v3145_v8  ;;  %v2020_v0 = vsel %vm1560_vm6, %v2019_v9, %v3146_v7 }
 0xaa9   : > { %v2021_v12 = vpack.c.bf16 %v2020_v0, %v1561_v11 }
 0xaab   : > { %2957 = vmatmul.mubr.msk.bf16.vlgmr.msra.gmra.mrb[40].mxu0 %vm4588_vm0, %v2021_v12 }
 0xb7e   : > { %v2082_v13 = vpop.f32.mrb[40].mxu0 }
 0xb7f   : > { %v2083_v14 = vadd.f32 %v2745_v1, %v2082_v13  ;;  %v2958_v16 = vpop.f32.mrb[41].mxu0 }
 0xb80   : > { %v2085_v17 = vpop.f32.mrb[42].mxu0 }
 0xb81   : > { %v2089_v18 = vadd.f32 %v2083_v14, %v4099_v2  ;;  %v2086_v19 = vadd.f32 %v2745_v1, %v2085_v17  ;;  %v2959_v20 = vpop.f32.mrb[43].mxu0 }
 0xb83   : > { %2091 = vst.msk [vmem:[%s4306_s28] sm:$0xff] %vm4588_vm0, %v2089_v18  ;;  %v2090_v21 = vadd.f32 %v2086_v19, %v4102_v4  ;;  %v2095_v22 = vsel %vm4588_vm0, %v2089_v18, 0.0 }
 0xb84   : > { %2096 = vadd.xlane.f32.xlu1 %v2095_v22 }
 0xb85   : > { %2092 = vst.msk [vmem:[%s4306_s28 + $0x8] sm:$0xff] %vm4588_vm0, %v2090_v21  ;;  %v2098_v23 = vsel %vm4588_vm0, %v2090_v21, 0.0 }
 0xb86   : > { %2099 = vadd.xlane.f32.xlu0 %v2098_v23 }
 0xc11   : > { %v2097_v2 = vpop.xlane.xlu1 %2096 }
 0xc12   : > { %v2101_v24 = vmul.f32 0.03125, %v2097_v2 }
 0xc13   : > { %v2100_v25 = vpop.xlane.xlu0 %2099 }
 0xc14   : > { %v2103_v26 = vsub.f32 %v2089_v18, %v2101_v24  ;;  %v2102_v27 = vmul.f32 0.03125, %v2100_v25 }
 0xc16   : > { %v2104_v28 = vsub.f32 %v2090_v21, %v2102_v27  ;;  %v2105_v29 = vmul.f32 %v2103_v26, %v2103_v26 }
 0xc18   : > { %v2107_v30 = vsel %vm4588_vm0, %v2105_v29, 0.0  ;;  %v2106_v31 = vmul.f32 %v2104_v28, %v2104_v28 }
 0xc19   : > { %2108 = vadd.xlane.f32.xlu0 %v2107_v30 }
 0xc1a   : > { %v2110_v4 = vsel %vm4588_vm0, %v2106_v31, 0.0 }
 0xc1d   : > { %2111 = vadd.xlane.f32.xlu0 %v2110_v4 }
 0xca6   : > { %v2109_v34 = vpop.xlane.xlu0 %2108 }
 0xca7   : > { %v2113_v35 = vmul.f32 0.03125, %v2109_v34 }
 0xca9   : > { %v2115_v40 = vadd.f32 1e-05, %v2113_v35 }
 0xcaa   : > { %v2112_v36 = vpop.xlane.xlu0 %2111 }
 0xcab   : > { %3203 = vrsqrt.f32 %v2115_v40  ;;  %v2114_v37 = vmul.f32 0.03125, %v2112_v36 }
 0xcad   : > { %v2116_v38 = vadd.f32 1e-05, %v2114_v37 }
 0xcaf   : > { %3205 = vrsqrt.f32 %v2116_v38 }
 0xcb5   : > { %v3204_v39 = vpop.eup %3203 }
 0xcb6   : > { %v2119_v41 = vmul.f32 %v3204_v39, %v2103_v26 }
 0xcb8   : > { %v2127_v45 = vmul.f32 %v2749_v42, %v2119_v41 }
 0xcb9   : > { %v3206_v44 = vpop.eup %3205 }
 0xcba   : > { %v2120_v43 = vmul.f32 %v3206_v44, %v2104_v28  ;;  %v2135_v48 = vadd.f32 %v2750_v46, %v2127_v45 }
 0xcbc   : > { %v2128_v47 = vmul.f32 %v2749_v42, %v2120_v43 }
 0xcbe   : > { %v2136_v49 = vadd.f32 %v2750_v46, %v2128_v47 }
 0xcc0   : > { %v2137_v15 = vpack.c.bf16 %v2136_v49, %v2135_v48 }
 0xcc2   : > { %2965 = vmatmul.mubr.msk.bf16.vlgmr.msra.gmra.mrb[36].mxu1 %vm4588_vm0, %v2137_v15 }
 0xd95   : > { %v2198_v51 = vpop.f32.mrb[36].mxu1 }
 0xd96   : > { %v4328_v52 = vadd.f32 %v2751_v50, %v2198_v51  ;;  %v2966_v53 = vpop.f32.mrb[37].mxu1 }
 0xd97   : > { %v2201_v54 = vpop.f32.mrb[38].mxu1 }
 0xd98   : > { %v2205_v55 = vmul.f32 0.5, %v4328_v52  ;;  %v4331_v56 = vadd.f32 %v2751_v50, %v2201_v54  ;;  %v2967_v57 = vpop.f32.mrb[39].mxu1 }
 0xd9a   : > { %3207 = vtanh.f32 %v2205_v55  ;;  %v2206_v58 = vmul.f32 0.5, %v4331_v56 }
 0xd9c   : > { %3209 = vtanh.f32 %v2206_v58 }
 0xda4   : > { %v3208_v59 = vpop.eup %3207 }
 0xda5   : > { %v2209_v60 = vadd.f32 1.0, %v3208_v59 }
 0xda6   : > { %v3210_v61 = vpop.eup %3209 }
 0xda7   : > { %v2211_v62 = vmul.f32 0.5, %v2209_v60  ;;  %v2210_v63 = vadd.f32 1.0, %v3210_v61 }
 0xda9   : > { %2215 = vrot.lane.b32.xlu1 %v2211_v62, %s3626_s26  ;;  %v2212_v3 = vmul.f32 0.5, %v2210_v63 }
 0xdab   : > { %2217 = vrot.lane.b32.xlu0 %v2212_v3, %s3626_s26  ;;  %s3639_s26 = smov [#allocation19]  }
 0xdac   : > { %s3495_s3 = sshll.u32 %s3639_s26, 4  ;;  %s3496_s3 = int_to_ptr.vmem [resolvable:$false] %s3495_s3 }
 0xdad   : > { %s3497_s1 = scalar_lea.vmem %s3496_s3, 512  ;;  %p3498_p5 = scmp.lt.s32.totalorder %s4345_s0, %s3496_s3 }
 0xdae   : > { %p3499_p9 = scmp.lt.s32.totalorder %s3497_s1, %s3491_s7 }
 0xdb0   : > { %p3500_p12 = por %p3499_p9, %p3498_p5 }
 0xdb2   : > { %p3501_p10 = pnand %p3500_p12, %p3494_p6 }
 0xdb4   : > { %3504 = shalt.err (!%p3501_p10)
}
 0xdb5   : > { %s3505_s28 = scalar_lea.hbm %s4342_s17, 256  ;;  %s3509_s24 = scalar_lea.hbm %s4631_s21, 512 }
 0xdb6   : > { %p3506_p2 = scmp.ne.s32.totalorder %s4342_s17, %s3505_s28  ;;  %p3510_p7 = scmp.lt.u32.totalorder %s4342_s17, %s4631_s21 }
 0xdb7   : > { %p3511_p8 = scmp.lt.u32.totalorder %s3509_s24, %s3505_s28  ;;  %p3513_p13 = scmp.lt.u32.totalorder %s3505_s28, %s4342_s17 }
 0xdb8   : > { %p3507_p3 = pnand %p3506_p2, %p4632_p0 }
 0xdb9   : > { %p3512_p11 = por %p3511_p8, %p3510_p7 }
 0xdba   : > { %p3508_p4 = pneg %p3507_p3 }
 0xdbb   : > { %p3514_p1 = por %p3513_p13, %p3512_p11 }
 0xdbd   : > { %p3515_p6 = pnand %p3514_p1, %p3508_p4 }
 0xdbf   : > { %3518 = shalt.err (!%p3515_p6)
}
 0xdc0   : > { %s3640_s7 = smov 128   ;;  %v2223_v5 = vlaneseq  ;;  %s4635_s26 = sld [smem:[#allocation44_spill]] }
 0xdc1   : > { %3008 = dma.vmem_to_hbm [thread:$0]  (%p4632_p0), %s4345_s0, 256, %s4342_s17, %s2457_s19, %s3640_s7, %s3640_s7, %s3636_s6  }
 0xdc2   : > { %v4374_v6 = vshrl.u32 %v2223_v5, 7  ;;  %s4633_s19 = sld [smem:[#allocation43_spill]]  ;;  %s762_s3 = scalar_lea.vmem [#allocation20], %s2707_s29 }
 0xdc3   : > { %s2491_s17 = sshll.u32 %s762_s3, 4  ;;  %s4636_s28 = sld [smem:[#allocation46_spill]]  ;;  %s4503_s17 = int_to_ptr.vmem [resolvable:$true] %s2491_s17 }
 0xdc4   : > { %v2225_v7 = vadd.s32 8, %v4374_v6  ;;  %v2230_v8 = vand.u32 7, %v4374_v6  ;;  %vm2262_vm7 = vcmp.lt.s32.totalorder %v4374_v6, 3  ;;  %vm2292_vm8 = vcmp.lt.s32.totalorder %v4374_v6, 2  ;;  %s2462_s29 = scalar_lea.sflag [#allocation21], %s4300_s23  ;;  %s3519_s25 = scalar_lea.vmem %s4503_s17, 256 }
 0xdc5   : > { %vm2323_vm9 = vcmp.lt.s32.totalorder %v4374_v6, 1  ;;  %vm2354_vm12 = vcmp.lt.s32.totalorder %v4374_v6, 7  ;;  %vm2385_vm4 = vcmp.lt.s32.totalorder %v4374_v6, 6  ;;  %vm2416_vm0 = vcmp.lt.s32.totalorder %v4374_v6, 5  ;;  %p3520_p5 = scmp.ne.s32.totalorder %s4503_s17, %s3519_s25  ;;  %s3641_s2 = smov [#allocation20]  }
 0xdc6   : > { %v2237_v9 = vand.u32 7, %v2225_v7  ;;  %v2265_v10 = vadd.s32 4294967293, %v2230_v8  ;;  %v2295_v0 = vadd.s32 4294967294, %v2230_v8  ;;  %v4378_v1 = vadd.s32 4294967295, %v2230_v8  ;;  %v2768_v6 = vld [vmem:[%s4635_s26] ss:$0 sm:$0xff] }
 0xdc7   : > { %v4383_v14 = vadd.s32 1, %v2230_v8  ;;  %v4389_v18 = vadd.s32 2, %v2230_v8  ;;  %v4405_v23 = vadd.s32 3, %v2230_v8  ;;  %p3521_p9 = pnand %p3520_p5, %p4632_p0  ;;  %s3523_s24 = sshll.u32 %s3641_s2, 4  ;;  %s3524_s24 = int_to_ptr.vmem [resolvable:$false] %s3523_s24 }
 0xdc8   : > { %v2266_v11 = vadd.s32 4294967293, %v2237_v9  ;;  %v2296_v12 = vadd.s32 4294967294, %v2237_v9  ;;  %v4380_v13 = vadd.s32 4294967295, %v2237_v9  ;;  %v4385_v16 = vadd.s32 1, %v2237_v9  ;;  %v2756_v20 = vld [vmem:[%s4633_s19 + $0x3] ss:$0 sm:$0xff]  ;;  %p3526_p10 = scmp.lt.s32.totalorder %s4503_s17, %s3524_s24 }
 0xdc9   : > { %v4391_v19 = vadd.s32 2, %v2237_v9  ;;  %vm2267_vm10 = vcmp.ge.s32.totalorder %v2265_v10, 0  ;;  %vm2297_vm13 = vcmp.ge.s32.totalorder %v2295_v0, 0  ;;  %vm2328_vm15 = vcmp.ge.s32.totalorder %v4378_v1, 0  ;;  %v2757_v31 = vld [vmem:[%s4633_s19] ss:$0 sm:$0xff]  ;;  %s4501_s30 = scalar_lea.hbm %s4636_s28, %s2777_s27  ;;  %p3522_p12 = pneg %p3521_p9 }
 0xdca   : > { %vm2268_vm11 = vcmp.ge.s32.totalorder %v2266_v11, 0  ;;  %vm2298_vm14 = vcmp.ge.s32.totalorder %v2296_v12, 0  ;;  %vm2329_vm1 = vcmp.ge.s32.totalorder %v4380_v13, 0  ;;  %vm2361_vm2 = vcmp.lt.s32.totalorder %v4383_v14, 8  ;;  %v2759_v34 = vld [vmem:[%s4633_s19 + $0x1] ss:$0 sm:$0xff] }
 0xdcb   : > { %vm2362_vm3 = vcmp.lt.s32.totalorder %v4385_v16, 8  ;;  %vm2392_vm5 = vcmp.lt.s32.totalorder %v4389_v18, 8  ;;  %v4413_v25 = vadd.s32 3, %v2237_v9  ;;  %vm2423_vm6 = vcmp.lt.s32.totalorder %v4405_v23, 8  ;;  %v2761_v47 = vld [vmem:[%s4633_s19 + $0x2] ss:$0 sm:$0xff] }
 0xdcc   : > { %v2763_v63 = vld [vmem:[%s4633_s19 + $0x4] ss:$0 sm:$0xff]  ;;  %v2765_v9 = vld [vmem:[%s4633_s19 + $0x5] ss:$0 sm:$0xff]  ;;  %v2767_v18 = vld [vmem:[%s4633_s19 + $0x6] ss:$0 sm:$0xff] }
 0xdcd   : > { %s3525_s27 = scalar_lea.vmem %s3524_s24, 512 }
 0xdce   : > { %p3527_p2 = scmp.lt.s32.totalorder %s3525_s27, %s3519_s25 }
 0xdd0   : > { %p3528_p3 = por %p3527_p2, %p3526_p10 }
 0xdd2   : > { %p3529_p4 = pnand %p3528_p3, %p3522_p12 }
 0xe1b   : > { %v2216_v17 = vpop.permute.xlu1 %2215 }
 0xe1c   : > { %v4397_v21 = vmul.f32 %v2216_v17, %v4328_v52 }
 0xe1d   : > { %v2218_v22 = vpop.permute.xlu0 %2217 }
 0xe1e   : > { %v2258_v2 = vmul.f32 %v2756_v20, %v4397_v21  ;;  %v4409_v24 = vmul.f32 %v2218_v22, %v4331_v56  ;;  %v2260_v26 = vrot.slane %v4397_v21, 5  ;;  %v2290_v27 = vrot.slane %v4397_v21, 6 }
 0xe1f   : > { %v2321_v28 = vrot.slane %v4397_v21, 7  ;;  %v2352_v29 = vrot.slane %v4397_v21, 1  ;;  %v2383_v30 = vrot.slane %v4397_v21, 2  ;;  %v2414_v10 = vrot.slane %v4397_v21, 3 }
 0xe20   : > { %v2259_v4 = vmul.f32 %v2756_v20, %v4409_v24  ;;  %v2261_v32 = vrot.slane %v4409_v24, 5  ;;  %v2291_v33 = vrot.slane %v4409_v24, 6  ;;  %v2322_v35 = vrot.slane %v4409_v24, 7 }
 0xe21   : > { %v2353_v40 = vrot.slane %v4409_v24, 1  ;;  %v2384_v36 = vrot.slane %v4409_v24, 2  ;;  %v2415_v37 = vrot.slane %v4409_v24, 3 }
 0xe22   : > { %v2263_v38 = vsel %vm2262_vm7, %v2260_v26, %v2261_v32  ;;  %v2264_v39 = vsel %vm2262_vm7, %v2261_v32, %v2260_v26  ;;  %v2293_v41 = vsel %vm2292_vm8, %v2290_v27, %v2291_v33  ;;  %v2294_v42 = vsel %vm2292_vm8, %v2291_v33, %v2290_v27 }
 0xe23   : > { %v2277_v44 = vsel %vm2267_vm10, %v2264_v39, 0.0  ;;  %v2278_v45 = vsel %vm2268_vm11, %v2263_v38, 0.0  ;;  %v2307_v43 = vsel %vm2297_vm13, %v2294_v42, 0.0  ;;  %v2308_v46 = vsel %vm2298_vm14, %v2293_v41, 0.0 }
 0xe24   : > { %v2286_v48 = vmul.f32 %v2757_v31, %v2277_v44  ;;  %v2287_v49 = vmul.f32 %v2757_v31, %v2278_v45  ;;  %v2317_v15 = vmul.f32 %v2759_v34, %v2307_v43  ;;  %v2318_v50 = vmul.f32 %v2759_v34, %v2308_v46 }
 0xe25   : > { %v2324_v51 = vsel %vm2323_vm9, %v2321_v28, %v2322_v35  ;;  %v2325_v52 = vsel %vm2323_vm9, %v2322_v35, %v2321_v28  ;;  %v2355_v53 = vsel %vm2354_vm12, %v2352_v29, %v2353_v40  ;;  %v2356_v54 = vsel %vm2354_vm12, %v2353_v40, %v2352_v29 }
 0xe26   : > { %v2288_v55 = vadd.f32 %v2286_v48, %v2258_v2  ;;  %v2289_v56 = vadd.f32 %v2287_v49, %v2259_v4  ;;  %v2338_v57 = vsel %vm2328_vm15, %v2325_v52, 0.0  ;;  %v2339_v58 = vsel %vm2329_vm1, %v2324_v51, 0.0 }
 0xe27   : > { %v2348_v59 = vmul.f32 %v2761_v47, %v2338_v57  ;;  %v2349_v60 = vmul.f32 %v2761_v47, %v2339_v58  ;;  %v2369_v61 = vsel %vm2361_vm2, %v2355_v53, 0.0  ;;  %v2370_v62 = vsel %vm2362_vm3, %v2356_v54, 0.0 }
 0xe28   : > { %v2320_v3 = vadd.f32 %v2318_v50, %v2289_v56  ;;  %v2386_v5 = vsel %vm2385_vm4, %v2383_v30, %v2384_v36  ;;  %v2387_v7 = vsel %vm2385_vm4, %v2384_v36, %v2383_v30  ;;  %v2319_v8 = vadd.f32 %v2317_v15, %v2288_v55 }
 0xe29   : > { %v2400_v11 = vsel %vm2392_vm5, %v2386_v5, 0.0  ;;  %vm4634_vm7 = vcmp.lt.s32.totalorder %v4391_v19, 8  ;;  %vm2424_vm8 = vcmp.lt.s32.totalorder %v4413_v25, 8  ;;  %v2379_v13 = vmul.f32 %v2763_v63, %v2369_v61 }
 0xe2a   : > { %v2401_v0 = vsel %vm4634_vm7, %v2387_v7, 0.0  ;;  %v2351_v12 = vadd.f32 %v2349_v60, %v2320_v3  ;;  %v2350_v1 = vadd.f32 %v2348_v59, %v2319_v8  ;;  %v2380_v14 = vmul.f32 %v2763_v63, %v2370_v62 }
 0xe2b   : > { %v2410_v16 = vmul.f32 %v2765_v9, %v2400_v11  ;;  %v2411_v17 = vmul.f32 %v2765_v9, %v2401_v0  ;;  %v2417_v20 = vsel %vm2416_vm0, %v2414_v10, %v2415_v37  ;;  %v2418_v21 = vsel %vm2416_vm0, %v2415_v37, %v2414_v10 }
 0xe2c   : > { %v2381_v19 = vadd.f32 %v2379_v13, %v2350_v1  ;;  %v2382_v22 = vadd.f32 %v2380_v14, %v2351_v12  ;;  %v2431_v2 = vsel %vm2423_vm6, %v2417_v20, 0.0  ;;  %v2432_v24 = vsel %vm2424_vm8, %v2418_v21, 0.0 }
 0xe2d   : > { %v2441_v27 = vmul.f32 %v2767_v18, %v2431_v2  ;;  %v2442_v28 = vmul.f32 %v2767_v18, %v2432_v24  ;;  %vm4637_vm0 = vcmask 261120  }
 0xe2e   : > { %v2412_v25 = vadd.f32 %v2410_v16, %v2381_v19  ;;  %v2413_v26 = vadd.f32 %v2411_v17, %v2382_v22  ;;  %vm4638_vm9 = vmmov %vm4637_vm0 }
 0xe30   : > { %v2443_v29 = vadd.f32 %v2441_v27, %v2412_v25  ;;  %v2444_v30 = vadd.f32 %v2442_v28, %v2413_v26 }
 0xe32   : > { %v2452_v31 = vadd.f32 %v2768_v6, %v2443_v29  ;;  %v2453_v4 = vadd.f32 %v2768_v6, %v2444_v30 }
 0xe34   : > { %2454 = vst.msk [vmem:[%s762_s3] sm:$0xff] %vm4637_vm0, %v2452_v31 }
 0xe35   : > { %2455 = vst.msk [vmem:[%s762_s3 + $0x8] sm:$0xff] %vm4638_vm9, %v2453_v4 }
 0xe36   : > { %3532 = shalt.err (!%p3529_p4)
}
 0xe37   : > { %s3533_s26 = scalar_lea.hbm %s4501_s30, 256  ;;  %s3537_s1 = scalar_lea.hbm %s4636_s28, 512 }
 0xe38   : > { %p3534_p7 = scmp.ne.s32.totalorder %s4501_s30, %s3533_s26  ;;  %p3538_p13 = scmp.lt.u32.totalorder %s4501_s30, %s4636_s28 }
 0xe39   : > { %p3539_p1 = scmp.lt.u32.totalorder %s3537_s1, %s3533_s26  ;;  %p3541_p5 = scmp.lt.u32.totalorder %s3533_s26, %s4501_s30 }
 0xe3a   : > { %p3535_p8 = pnand %p3534_p7, %p4632_p0 }
 0xe3b   : > { %p3540_p6 = por %p3539_p1, %p3538_p13 }
 0xe3c   : > { %p3536_p11 = pneg %p3535_p8 }
 0xe3d   : > { %p3542_p9 = por %p3541_p5, %p3540_p6 }
 0xe3f   : > { %p3543_p12 = pnand %p3542_p9, %p3536_p11 }
 0xe41   : > { %3546 = shalt.err (!%p3543_p12)
}
 0xe42   : > { %3009 = dma.vmem_to_hbm [thread:$0]  (%p4632_p0), %s4503_s17, 256, %s4501_s30, %s2462_s29, %s3640_s7, %s3640_s7, %s3636_s6  }
 0xe43 PF: > { %s4639_s25 = sld [smem:[#allocation32_spill]]  ;;  %s4640_s27 = sld [smem:[#allocation30_spill]] }
 0xe44   : > { %s4641_s3 = sld [smem:[#allocation35_spill]] }
 0xe49   : > { %p3070_p10 = scmp.ge.s32.totalorder %s4639_s25, 2  ;;  %s2506_s0 = sand.u32 1, %s4640_s27  }
 0xe4a   : > { %p4642_p2 = scmp.ne.s32.totalorder %s4641_s3, 0  ;;  %s2507_s26 = scalar_lea.sflag [#allocation4], %s2506_s0 }
 0xe4c   : > { %p3044_p3 = pnand %p3070_p10, %p4642_p2 }
 0xe4e   : > { %3588 = dma.done.wait (!%p3044_p3), %s2507_s26, 256  }
 0xe4f   : > { %3590 = vsyncadd (!%p3044_p3), %s2507_s26, 4294967040  ;;  %s2516_s4 = scalar_lea.sflag [#allocation21], %s2506_s0 }
 0xe50   : > { %3592 = dma.done.wait (!%p3044_p3), %s2516_s4, 256  }
 0xe51   : > { %3594 = vsyncadd (!%p3044_p3), %s2516_s4, 4294967040  ;;  %s4643_s24 = sld [smem:[#allocation33_spill]]  ;;  %s4644_s23 = sld [smem:[#allocation31_spill]] }
 0xe52   : > { %s4645_s2 = sld [smem:[#allocation34_spill]]  ;;  %s4646_s1 = smov %s3601_s22 }
 0xe57   : > { %p40_p0 = scmp.ge.s32.totalorder %s4643_s24, 4   ;;  %s4647_s22 = smov %s4644_s23 }
 0xe58   : > { %s4648_s23 = smov %s4645_s2 }
 0xe59   :  { %42 = sbr.rel (!%p40_p0) target bundleno = 23 (0x17), region = 195 }
 0xe60   :  { %2521 = vsyncpa [#allocation3], 1 }
 0xe61   :  { %2523 = vsyncpa [#allocation3 + $0x1], 1 }
 0xe62   :  { %2524 = vsyncpa [#allocation6], 1 }
 0xe63   :  { %2525 = vsyncpa [#allocation9], 1 }
 0xe64   :  { %2526 = vsyncpa [#allocation12], 1 }
 0xe65   :  { %2527 = vsyncpa [#allocation15], 1 }
 0xe66   :  { %2528 = vsyncpa [#allocation18], 1 }
 0xe67   :  { %2529 = vsyncpa [#allocation4], 1 }
 0xe68   :  { %2531 = vsyncpa [#allocation4 + $0x1], 1 }
 0xe69   :  { %2532 = vsyncpa [#allocation21], 1 }
 0xe6a   :  { %2534 = vsyncpa [#allocation21 + $0x1], 1 }

</bundles_post_ra>
